<compile_context>
chip_gen: v6e
topology: v6e:2x2x1
jax: 0.10.0
libtpu: 0.0.40
codegen_flags: <defaults>
</compile_context>

<pallas_src>
import functools

import jax
import jax.numpy as jnp
import numpy as np
from jax.experimental import pallas as pl
from jax.experimental.pallas import tpu as pltpu


def _gat2_kernel(tab_ref, c_ref, tl_ref, tr_ref, au_ref, ad_ref,
                 w1_ref, b1_ref, g1_ref, w2_ref, b2_ref, g2_ref,
                 out_ref, *, lp, din_true, dout_true):
    rows = tab_ref.shape[0]            # Bt * Lp * Lp (multiple of 8)
    eps = 1e-12

    center = c_ref[...]                # [rows, 1]  == 1 + softmax(syntax scores)
    t_left = tl_ref[...]               # [rows, 1]  t_simi with src col j=Lp-1 zeroed
    t_right = tr_ref[...]              # [rows, 1]  t_simi with src col j=0    zeroed
    a_up = au_ref[...]                 # [rows, 1]  a_simi with src row i=Lp-1 zeroed
    a_down = ad_ref[...]               # [rows, 1]  a_simi with src row i=0    zeroed

    def gather_attend(h):
        # h*(1+attn) + left + right + up + down neighbours.
        # Shifts are sublane rolls of the flattened (b,i,j) row axis; the edge
        # zeroing is pre-folded into the masked t_/a_ maps, so every row that
        # wraps around a (batch, i) boundary is already zero.
        left = pltpu.roll(h * t_left, 1, 0)            # out[b,i,j] <- src[b,i,j-1]
        right = pltpu.roll(h * t_right, rows - 1, 0)   # out[b,i,j] <- src[b,i,j+1]
        up = pltpu.roll(h * a_up, lp, 0)               # out[b,i,j] <- src[b,i-1,j]
        down = pltpu.roll(h * a_down, rows - lp, 0)    # out[b,i,j] <- src[b,i+1,j]
        return h * center + left + right + up + down

    def dense_norm_relu(h, w_ref, b_ref, g_ref, d_true):
        w = w_ref[...]
        y = jnp.dot(h.astype(w.dtype), w,
                    preferred_element_type=jnp.float32) + b_ref[...]
        # T5 RMS norm over the true (unpadded) channel count; padded lanes are
        # exactly zero (zero weight columns / bias / gain) so they do not
        # perturb the variance and stay zero after the norm and ReLU.
        var = jnp.sum(y * y, axis=-1, keepdims=True) * (1.0 / d_true)
        y = y * jax.lax.rsqrt(var + eps) * g_ref[...]
        return jnp.maximum(y, 0.0)

    h1 = dense_norm_relu(gather_attend(tab_ref[...]),
                         w1_ref, b1_ref, g1_ref, din_true)
    out_ref[...] = dense_norm_relu(gather_attend(h1),
                                   w2_ref, b2_ref, g2_ref, dout_true)


def _round_up(x, m):
    return (x + m - 1) // m * m


def _pick_batch_tile(batch, rows_per_batch, dinp, dp,
                     target_rows=256, vmem_budget=24 << 20):
    """Batch elements per grid step: enough rows to fill the MXU M dimension,
    but small enough that I/O double buffers + ~8 live slabs fit VMEM."""
    per_batch = rows_per_batch * 4 * (2 * dinp + 2 * dp + 8 * max(dinp, dp))
    cap = max(1, vmem_budget // max(per_batch, 1))
    want = max(1, -(-target_rows // rows_per_batch))     # cdiv
    bt = int(max(1, min(batch, cap, want)))
    while batch % bt:
        bt -= 1
    return max(bt, 1)


def syntax_attention_gat2(table, a_simi, t_simi, syntax_matrix,
                          w1, b1, g1, w2, b2, g2, dep_embedding,
                          matmul_dtype=jnp.float32):
    """Pallas implementation of SyntaxAttentionGAT2.forward (dropout unused)."""
    B, L, _, Din = table.shape
    Dout = w2.shape[0]
    f32 = jnp.float32

    Lp = _round_up(L, 8)        # sublane-aligned sequence length
    Dinp = _round_up(Din, 128)  # lane-dense input channels
    Dp = _round_up(Dout, 128)   # lane-dense output channels (e.g. 64 -> 128)

    # ---- glue: syntax attention (embedding gather + softmax over j) --------
    emb_sum = jnp.sum(dep_embedding, axis=-1)                      # [labels]
    scores = emb_sum[syntax_matrix[:, :L, :L]].astype(f32)         # [B,L,L]
    attn = jax.nn.softmax(scores, axis=2)
    attn = jnp.pad(attn, ((0, 0), (0, Lp - L), (0, Lp - L)))
    center = 1.0 + attn                                            # folds h + h*attn

    # ---- glue: pre-masked similarity maps (edge zeroing folded in) ---------
    a_p = jnp.pad(a_simi.astype(f32), ((0, 0), (0, Lp - L)))       # over i
    t_p = jnp.pad(t_simi.astype(f32), ((0, 0), (0, Lp - L)))       # over j
    idx = jnp.arange(Lp)
    t_left = jnp.where(idx == Lp - 1, 0.0, t_p)[:, None, :]        # zero src j=Lp-1
    t_right = jnp.where(idx == 0, 0.0, t_p)[:, None, :]            # zero src j=0
    a_up = jnp.where(idx == Lp - 1, 0.0, a_p)[:, :, None]          # zero src i=Lp-1
    a_down = jnp.where(idx == 0, 0.0, a_p)[:, :, None]             # zero src i=0

    def flat_map(m):
        return jnp.broadcast_to(m, (B, Lp, Lp)).reshape(B * Lp * Lp, 1)

    maps = [flat_map(center), flat_map(t_left), flat_map(t_right),
            flat_map(a_up), flat_map(a_down)]

    # ---- glue: pad + flatten the feature table, pad the parameters ---------
    table_p = jnp.pad(table.astype(f32),
                      ((0, 0), (0, Lp - L), (0, Lp - L), (0, Dinp - Din)))
    table_flat = table_p.reshape(B * Lp * Lp, Dinp)

    w1t = jnp.pad(w1.T.astype(f32), ((0, Dinp - Din), (0, Dinp - Din)))
    w2t = jnp.pad(w2.T.astype(f32), ((0, Dinp - Din), (0, Dp - Dout)))
    w1t = w1t.astype(matmul_dtype)
    w2t = w2t.astype(matmul_dtype)
    b1p = jnp.pad(b1.astype(f32), (0, Dinp - Din)).reshape(1, Dinp)
    g1p = jnp.pad(g1.astype(f32), (0, Dinp - Din)).reshape(1, Dinp)
    b2p = jnp.pad(b2.astype(f32), (0, Dp - Dout)).reshape(1, Dp)
    g2p = jnp.pad(g2.astype(f32), (0, Dp - Dout)).reshape(1, Dp)

    # ---- grid: Bt batches per step -> matmul M = Bt*Lp*Lp rows -------------
    rows_per_batch = Lp * Lp
    Bt = _pick_batch_tile(B, rows_per_batch, Dinp, Dp)
    R = Bt * rows_per_batch
    total_rows = B * rows_per_batch
    grid = (B // Bt,)

    def row_spec(width):
        return pl.BlockSpec((R, width), lambda b: (b, 0))

    def full_spec(shape):
        return pl.BlockSpec(shape, lambda b: (0, 0))

    in_specs = ([row_spec(Dinp)] + [row_spec(1)] * 5 +
                [full_spec((Dinp, Dinp)), full_spec((1, Dinp)), full_spec((1, Dinp)),
                 full_spec((Dinp, Dp)), full_spec((1, Dp)), full_spec((1, Dp))])
    out_specs = row_spec(Dp)

    weight_bytes = (w1t.size * w1t.dtype.itemsize
                    + w2t.size * w2t.dtype.itemsize
                    + (b1p.size + g1p.size + b2p.size + g2p.size) * 4)
    cost = pl.CostEstimate(
        flops=2 * total_rows * Dinp * (Dinp + Dp) + 20 * total_rows * Dinp,
        transcendentals=2 * total_rows,
        bytes_accessed=(table_flat.size + total_rows * Dp + 5 * total_rows) * 4
                       + weight_bytes)

    vmem_need = R * 4 * (2 * Dinp + 2 * Dp + 8 * max(Dinp, Dp)) + 2 * weight_bytes
    vmem_limit = int(min(max(vmem_need, 16 << 20), 48 << 20))

    kernel = functools.partial(_gat2_kernel, lp=Lp, din_true=Din, dout_true=Dout)
    out_flat = pl.pallas_call(
        kernel,
        out_shape=jax.ShapeDtypeStruct((total_rows, Dp), f32),
        grid=grid,
        in_specs=in_specs,
        out_specs=out_specs,
        cost_estimate=cost,
        compiler_params=pltpu.CompilerParams(
            dimension_semantics=("parallel",),
            vmem_limit_bytes=vmem_limit),
    )(table_flat, *maps, w1t, b1p, g1p, w2t, b2p, g2p)

    return out_flat.reshape(B, Lp, Lp, Dp)[:, :L, :L, :Dout]


def reference(table, a_simi, t_simi, syntax_matrix,
              w1, b1, g1, w2, b2, g2, dep_embedding):
    """Pure-JAX mirror of the PyTorch forward (for validation)."""
    B, L, _, Din = table.shape
    dep_emb = dep_embedding[syntax_matrix[:, :L, :L]]
    scores = jnp.sum(dep_emb, axis=-1, keepdims=True)          # [B,L,L,1]
    attn = jax.nn.softmax(scores, axis=2)
    a2 = jnp.broadcast_to(a_simi[:, :, None], (B, L, L))[..., None]
    t2 = jnp.broadcast_to(t_simi[:, None, :], (B, L, L))[..., None]

    def gether(h):
        d = h.shape[-1]
        h_y = h * t2
        h_x = h * a2
        zc = jnp.zeros((B, L, 1, d), h.dtype)
        zr = jnp.zeros((B, 1, L, d), h.dtype)
        h_left = jnp.concatenate([zc, h_y], axis=2)[:, :, :-1, :]
        h_right = jnp.concatenate([h_y, zc], axis=2)[:, :, 1:, :]
        h_up = jnp.concatenate([zr, h_x], axis=1)[:, :-1, :, :]
        h_down = jnp.concatenate([h_x, zr], axis=1)[:, 1:, :, :]
        return h + h_left + h_right + h_up + h_down

    def t5norm(x, g, eps=1e-12):
        var = jnp.mean(x * x, axis=-1, keepdims=True)
        return g * (x / jnp.sqrt(var + eps))

    h0 = table
    h1 = gether(h0) + h0 * attn
    h1 = jax.nn.relu(t5norm(h1 @ w1.T + b1, g1))
    h2 = gether(h1) + h1 * attn
    h2 = jax.nn.relu(t5norm(h2 @ w2.T + b2, g2))
    return h2


if __name__ == "__main__":
    # Small shapes consistent with the module's forward semantics.
    B, L, Lmax = 2, 8, 12
    Din, Dout = 128, 64
    num_dep_labels, dep_dim = 12, 16

    key = jax.random.PRNGKey(0)
    ks = jax.random.split(key, 9)

    table = jax.random.normal(ks[0], (B, L, L, Din), jnp.float32)
    a_simi = jax.random.uniform(ks[1], (B, L), jnp.float32)
    t_simi = jax.random.uniform(ks[2], (B, L), jnp.float32)
    syntax_matrix = jax.random.randint(ks[3], (B, Lmax, Lmax), 0, num_dep_labels)

    # Deterministic synthetic parameters (shapes from the module __init__).
    w1 = jax.random.normal(ks[4], (Din, Din), jnp.float32) / jnp.sqrt(Din)
    b1 = jax.random.normal(ks[5], (Din,), jnp.float32) * 0.01
    w2 = jax.random.normal(ks[6], (Dout, Din), jnp.float32) / jnp.sqrt(Din)
    b2 = jax.random.normal(ks[7], (Dout,), jnp.float32) * 0.01
    g1 = jnp.ones((Din,), jnp.float32)     # T5LayerNorm(in_channel) weight
    g2 = jnp.ones((Dout,), jnp.float32)    # T5LayerNorm(out_channel) weight
    dep_embedding = jax.random.normal(ks[8], (num_dep_labels, dep_dim), jnp.float32)

    out = syntax_attention_gat2(table, a_simi, t_simi, syntax_matrix,
                                w1, b1, g1, w2, b2, g2, dep_embedding)
    out = jax.block_until_ready(out)

    ref = reference(table, a_simi, t_simi, syntax_matrix,
                    w1, b1, g1, w2, b2, g2, dep_embedding)
    np.testing.assert_allclose(np.asarray(out), np.asarray(ref),
                               rtol=2e-3, atol=2e-3)
    print("KERNEL_OK")
</pallas_src>

<mosaic_0001>
module attributes {stable_mosaic.version = 11 : i64} {
  func.func @_gat2_kernel(%arg0: i32, %arg1: memref<128x128xf32, #tpu.memory_space<vmem>>, %arg2: memref<128x1xf32, #tpu.memory_space<vmem>>, %arg3: memref<128x1xf32, #tpu.memory_space<vmem>>, %arg4: memref<128x1xf32, #tpu.memory_space<vmem>>, %arg5: memref<128x1xf32, #tpu.memory_space<vmem>>, %arg6: memref<128x1xf32, #tpu.memory_space<vmem>>, %arg7: memref<128x128xf32, #tpu.memory_space<vmem>>, %arg8: memref<1x128xf32, #tpu.memory_space<vmem>>, %arg9: memref<1x128xf32, #tpu.memory_space<vmem>>, %arg10: memref<128x128xf32, #tpu.memory_space<vmem>>, %arg11: memref<1x128xf32, #tpu.memory_space<vmem>>, %arg12: memref<1x128xf32, #tpu.memory_space<vmem>>, %arg13: memref<128x128xf32, #tpu.memory_space<vmem>>) attributes {dimension_semantics = [#tpu.dimension_semantics<parallel>], iteration_bounds = array<i64: 1>, scalar_prefetch = 0 : i64, scratch_operands = 0 : i64, tpu.core_type = #tpu.core_type<tc>, window_params = [{transform_indices = @transform_0, window_bounds = array<i64: 128, 128>}, {transform_indices = @transform_1, window_bounds = array<i64: 128, 1>}, {transform_indices = @transform_2, window_bounds = array<i64: 128, 1>}, {transform_indices = @transform_3, window_bounds = array<i64: 128, 1>}, {transform_indices = @transform_4, window_bounds = array<i64: 128, 1>}, {transform_indices = @transform_5, window_bounds = array<i64: 128, 1>}, {pipeline_mode = #tpu.pipeline_mode<synchronous>, transform_indices = @transform_6, window_bounds = array<i64: 128, 128>}, {pipeline_mode = #tpu.pipeline_mode<synchronous>, transform_indices = @transform_7, window_bounds = array<i64: 1, 128>}, {pipeline_mode = #tpu.pipeline_mode<synchronous>, transform_indices = @transform_8, window_bounds = array<i64: 1, 128>}, {pipeline_mode = #tpu.pipeline_mode<synchronous>, transform_indices = @transform_9, window_bounds = array<i64: 128, 128>}, {pipeline_mode = #tpu.pipeline_mode<synchronous>, transform_indices = @transform_10, window_bounds = array<i64: 1, 128>}, {pipeline_mode = #tpu.pipeline_mode<synchronous>, transform_indices = @transform_11, window_bounds = array<i64: 1, 128>}, {transform_indices = @transform_12, window_bounds = array<i64: 128, 128>}]} {
    %c0 = arith.constant 0 : index
    %c0_0 = arith.constant 0 : index
    %0 = vector.load %arg2[%c0, %c0_0] : memref<128x1xf32, #tpu.memory_space<vmem>>, vector<128x1xf32>
    %c0_1 = arith.constant 0 : index
    %c0_2 = arith.constant 0 : index
    %1 = vector.load %arg3[%c0_1, %c0_2] : memref<128x1xf32, #tpu.memory_space<vmem>>, vector<128x1xf32>
    %c0_3 = arith.constant 0 : index
    %c0_4 = arith.constant 0 : index
    %2 = vector.load %arg4[%c0_3, %c0_4] : memref<128x1xf32, #tpu.memory_space<vmem>>, vector<128x1xf32>
    %c0_5 = arith.constant 0 : index
    %c0_6 = arith.constant 0 : index
    %3 = vector.load %arg5[%c0_5, %c0_6] : memref<128x1xf32, #tpu.memory_space<vmem>>, vector<128x1xf32>
    %c0_7 = arith.constant 0 : index
    %c0_8 = arith.constant 0 : index
    %4 = vector.load %arg6[%c0_7, %c0_8] : memref<128x1xf32, #tpu.memory_space<vmem>>, vector<128x1xf32>
    %c0_9 = arith.constant 0 : index
    %c0_10 = arith.constant 0 : index
    %5 = vector.load %arg1[%c0_9, %c0_10] : memref<128x128xf32, #tpu.memory_space<vmem>>, vector<128x128xf32>
    %6 = vector.broadcast %1 : vector<128x1xf32> to vector<128x128xf32>
    %7 = arith.mulf %5, %6 : vector<128x128xf32>
    %c1_i32 = arith.constant 1 : i32
    %8 = tpu.dynamic_rotate %7 by %c1_i32 dim 0 : vector<128x128xf32>, i32 -> vector<128x128xf32>
    %9 = vector.broadcast %2 : vector<128x1xf32> to vector<128x128xf32>
    %10 = arith.mulf %5, %9 : vector<128x128xf32>
    %c127_i32 = arith.constant 127 : i32
    %11 = tpu.dynamic_rotate %10 by %c127_i32 dim 0 : vector<128x128xf32>, i32 -> vector<128x128xf32>
    %12 = vector.broadcast %3 : vector<128x1xf32> to vector<128x128xf32>
    %13 = arith.mulf %5, %12 : vector<128x128xf32>
    %c8_i32 = arith.constant 8 : i32
    %14 = tpu.dynamic_rotate %13 by %c8_i32 dim 0 : vector<128x128xf32>, i32 -> vector<128x128xf32>
    %15 = vector.broadcast %4 : vector<128x1xf32> to vector<128x128xf32>
    %16 = arith.mulf %5, %15 : vector<128x128xf32>
    %c120_i32 = arith.constant 120 : i32
    %17 = tpu.dynamic_rotate %16 by %c120_i32 dim 0 : vector<128x128xf32>, i32 -> vector<128x128xf32>
    %18 = vector.broadcast %0 : vector<128x1xf32> to vector<128x128xf32>
    %19 = arith.mulf %5, %18 : vector<128x128xf32>
    %20 = arith.addf %19, %8 : vector<128x128xf32>
    %21 = arith.addf %20, %11 : vector<128x128xf32>
    %22 = arith.addf %21, %14 : vector<128x128xf32>
    %23 = arith.addf %22, %17 : vector<128x128xf32>
    %c0_11 = arith.constant 0 : index
    %c0_12 = arith.constant 0 : index
    %24 = vector.load %arg7[%c0_11, %c0_12] : memref<128x128xf32, #tpu.memory_space<vmem>>, vector<128x128xf32>
    %cst = arith.constant dense<0.000000e+00> : vector<128x128xf32>
    %25 = tpu.matmul %23, %24, %cst {dimension_numbers = #tpu.dot_dimension_numbers<[1], [0], [0], [1], [0, 0, 1, 1], [], []>} : vector<128x128xf32>, vector<128x128xf32>, vector<128x128xf32> -> vector<128x128xf32>
    %c0_13 = arith.constant 0 : index
    %c0_14 = arith.constant 0 : index
    %26 = vector.load %arg8[%c0_13, %c0_14] : memref<1x128xf32, #tpu.memory_space<vmem>>, vector<1x128xf32>
    %27 = vector.broadcast %26 : vector<1x128xf32> to vector<128x128xf32>
    %28 = arith.addf %25, %27 : vector<128x128xf32>
    %29 = arith.mulf %28, %28 : vector<128x128xf32>
    %cst_15 = arith.constant dense<0.000000e+00> : vector<128xf32>
    %30 = vector.multi_reduction <add>, %29, %cst_15 [1] : vector<128x128xf32> to vector<128xf32>
    %31 = vector.shape_cast %30 : vector<128xf32> to vector<128x1xf32>
    %cst_16 = arith.constant 7.812500e-03 : f32
    %32 = vector.broadcast %cst_16 : f32 to vector<128x1xf32>
    %33 = arith.mulf %31, %32 : vector<128x1xf32>
    %cst_17 = arith.constant 9.99999996E-13 : f32
    %34 = vector.broadcast %cst_17 : f32 to vector<128x1xf32>
    %35 = arith.addf %33, %34 : vector<128x1xf32>
    %36 = math.rsqrt %35 : vector<128x1xf32>
    %37 = vector.broadcast %36 : vector<128x1xf32> to vector<128x128xf32>
    %38 = arith.mulf %28, %37 : vector<128x128xf32>
    %c0_18 = arith.constant 0 : index
    %c0_19 = arith.constant 0 : index
    %39 = vector.load %arg9[%c0_18, %c0_19] : memref<1x128xf32, #tpu.memory_space<vmem>>, vector<1x128xf32>
    %40 = vector.broadcast %39 : vector<1x128xf32> to vector<128x128xf32>
    %41 = arith.mulf %38, %40 : vector<128x128xf32>
    %cst_20 = arith.constant 0.000000e+00 : f32
    %42 = vector.broadcast %cst_20 : f32 to vector<128x128xf32>
    %43 = arith.maximumf %41, %42 : vector<128x128xf32>
    %44 = vector.broadcast %1 : vector<128x1xf32> to vector<128x128xf32>
    %45 = arith.mulf %43, %44 : vector<128x128xf32>
    %c1_i32_21 = arith.constant 1 : i32
    %46 = tpu.dynamic_rotate %45 by %c1_i32_21 dim 0 : vector<128x128xf32>, i32 -> vector<128x128xf32>
    %47 = vector.broadcast %2 : vector<128x1xf32> to vector<128x128xf32>
    %48 = arith.mulf %43, %47 : vector<128x128xf32>
    %c127_i32_22 = arith.constant 127 : i32
    %49 = tpu.dynamic_rotate %48 by %c127_i32_22 dim 0 : vector<128x128xf32>, i32 -> vector<128x128xf32>
    %50 = vector.broadcast %3 : vector<128x1xf32> to vector<128x128xf32>
    %51 = arith.mulf %43, %50 : vector<128x128xf32>
    %c8_i32_23 = arith.constant 8 : i32
    %52 = tpu.dynamic_rotate %51 by %c8_i32_23 dim 0 : vector<128x128xf32>, i32 -> vector<128x128xf32>
    %53 = vector.broadcast %4 : vector<128x1xf32> to vector<128x128xf32>
    %54 = arith.mulf %43, %53 : vector<128x128xf32>
    %c120_i32_24 = arith.constant 120 : i32
    %55 = tpu.dynamic_rotate %54 by %c120_i32_24 dim 0 : vector<128x128xf32>, i32 -> vector<128x128xf32>
    %56 = vector.broadcast %0 : vector<128x1xf32> to vector<128x128xf32>
    %57 = arith.mulf %43, %56 : vector<128x128xf32>
    %58 = arith.addf %57, %46 : vector<128x128xf32>
    %59 = arith.addf %58, %49 : vector<128x128xf32>
    %60 = arith.addf %59, %52 : vector<128x128xf32>
    %61 = arith.addf %60, %55 : vector<128x128xf32>
    %c0_25 = arith.constant 0 : index
    %c0_26 = arith.constant 0 : index
    %62 = vector.load %arg10[%c0_25, %c0_26] : memref<128x128xf32, #tpu.memory_space<vmem>>, vector<128x128xf32>
    %cst_27 = arith.constant dense<0.000000e+00> : vector<128x128xf32>
    %63 = tpu.matmul %61, %62, %cst_27 {dimension_numbers = #tpu.dot_dimension_numbers<[1], [0], [0], [1], [0, 0, 1, 1], [], []>} : vector<128x128xf32>, vector<128x128xf32>, vector<128x128xf32> -> vector<128x128xf32>
    %c0_28 = arith.constant 0 : index
    %c0_29 = arith.constant 0 : index
    %64 = vector.load %arg11[%c0_28, %c0_29] : memref<1x128xf32, #tpu.memory_space<vmem>>, vector<1x128xf32>
    %65 = vector.broadcast %64 : vector<1x128xf32> to vector<128x128xf32>
    %66 = arith.addf %63, %65 : vector<128x128xf32>
    %67 = arith.mulf %66, %66 : vector<128x128xf32>
    %cst_30 = arith.constant dense<0.000000e+00> : vector<128xf32>
    %68 = vector.multi_reduction <add>, %67, %cst_30 [1] : vector<128x128xf32> to vector<128xf32>
    %69 = vector.shape_cast %68 : vector<128xf32> to vector<128x1xf32>
    %cst_31 = arith.constant 1.562500e-02 : f32
    %70 = vector.broadcast %cst_31 : f32 to vector<128x1xf32>
    %71 = arith.mulf %69, %70 : vector<128x1xf32>
    %cst_32 = arith.constant 9.99999996E-13 : f32
    %72 = vector.broadcast %cst_32 : f32 to vector<128x1xf32>
    %73 = arith.addf %71, %72 : vector<128x1xf32>
    %74 = math.rsqrt %73 : vector<128x1xf32>
    %75 = vector.broadcast %74 : vector<128x1xf32> to vector<128x128xf32>
    %76 = arith.mulf %66, %75 : vector<128x128xf32>
    %c0_33 = arith.constant 0 : index
    %c0_34 = arith.constant 0 : index
    %77 = vector.load %arg12[%c0_33, %c0_34] : memref<1x128xf32, #tpu.memory_space<vmem>>, vector<1x128xf32>
    %78 = vector.broadcast %77 : vector<1x128xf32> to vector<128x128xf32>
    %79 = arith.mulf %76, %78 : vector<128x128xf32>
    %cst_35 = arith.constant 0.000000e+00 : f32
    %80 = vector.broadcast %cst_35 : f32 to vector<128x128xf32>
    %81 = arith.maximumf %79, %80 : vector<128x128xf32>
    %c0_36 = arith.constant 0 : index
    %c0_37 = arith.constant 0 : index
    %82 = vector.load %arg13[%c0_36, %c0_37] : memref<128x128xf32, #tpu.memory_space<vmem>>, vector<128x128xf32>
    tpu.vector_store %arg13[%c0_36, %c0_37], %81 {strides = array<i32>} : memref<128x128xf32, #tpu.memory_space<vmem>>, vector<128x128xf32>,
    return
  }
  func.func @transform_0(%arg0: i32) -> (i32, i32) {
    %c0_i32 = arith.constant 0 : i32
    %c0_i32_0 = arith.constant 0 : i32
    return %arg0, %c0_i32 : i32, i32
  }
  func.func @transform_1(%arg0: i32) -> (i32, i32) {
    %c0_i32 = arith.constant 0 : i32
    %c0_i32_0 = arith.constant 0 : i32
    return %arg0, %c0_i32 : i32, i32
  }
  func.func @transform_2(%arg0: i32) -> (i32, i32) {
    %c0_i32 = arith.constant 0 : i32
    %c0_i32_0 = arith.constant 0 : i32
    return %arg0, %c0_i32 : i32, i32
  }
  func.func @transform_3(%arg0: i32) -> (i32, i32) {
    %c0_i32 = arith.constant 0 : i32
    %c0_i32_0 = arith.constant 0 : i32
    return %arg0, %c0_i32 : i32, i32
  }
  func.func @transform_4(%arg0: i32) -> (i32, i32) {
    %c0_i32 = arith.constant 0 : i32
    %c0_i32_0 = arith.constant 0 : i32
    return %arg0, %c0_i32 : i32, i32
  }
  func.func @transform_5(%arg0: i32) -> (i32, i32) {
    %c0_i32 = arith.constant 0 : i32
    %c0_i32_0 = arith.constant 0 : i32
    return %arg0, %c0_i32 : i32, i32
  }
  func.func @transform_6(%arg0: i32) -> (i32, i32) {
    %c0_i32 = arith.constant 0 : i32
    %c0_i32_0 = arith.constant 0 : i32
    %c0_i32_1 = arith.constant 0 : i32
    return %c0_i32, %c0_i32_0 : i32, i32
  }
  func.func @transform_7(%arg0: i32) -> (i32, i32) {
    %c0_i32 = arith.constant 0 : i32
    %c0_i32_0 = arith.constant 0 : i32
    %c0_i32_1 = arith.constant 0 : i32
    return %c0_i32, %c0_i32_0 : i32, i32
  }
  func.func @transform_8(%arg0: i32) -> (i32, i32) {
    %c0_i32 = arith.constant 0 : i32
    %c0_i32_0 = arith.constant 0 : i32
    %c0_i32_1 = arith.constant 0 : i32
    return %c0_i32, %c0_i32_0 : i32, i32
  }
  func.func @transform_9(%arg0: i32) -> (i32, i32) {
    %c0_i32 = arith.constant 0 : i32
    %c0_i32_0 = arith.constant 0 : i32
    %c0_i32_1 = arith.constant 0 : i32
    return %c0_i32, %c0_i32_0 : i32, i32
  }
  func.func @transform_10(%arg0: i32) -> (i32, i32) {
    %c0_i32 = arith.constant 0 : i32
    %c0_i32_0 = arith.constant 0 : i32
    %c0_i32_1 = arith.constant 0 : i32
    return %c0_i32, %c0_i32_0 : i32, i32
  }
  func.func @transform_11(%arg0: i32) -> (i32, i32) {
    %c0_i32 = arith.constant 0 : i32
    %c0_i32_0 = arith.constant 0 : i32
    %c0_i32_1 = arith.constant 0 : i32
    return %c0_i32, %c0_i32_0 : i32, i32
  }
  func.func @transform_12(%arg0: i32) -> (i32, i32) {
    %c0_i32 = arith.constant 0 : i32
    %c0_i32_0 = arith.constant 0 : i32
    return %arg0, %c0_i32 : i32, i32
  }
}

</mosaic_0001>

<bundles_post_ra>
// kernel: tpu_custom_call.1
= control target key start
LH: loop header
LB: loop body
LE: loop exit
PB: predicated region body
PF: predicated region fallthrough
CT: control target
= control target key end

     0   :  { %v1900_v2 = vmov 0   ;;  %s3309_s0 = inlined_call_operand.vmem [shape: f32[128,128], index: 0, kind: input, shape index: {}]   ;;  %s3310_s1 = inlined_call_operand.vmem [shape: f32[128,1], index: 1, kind: input, shape index: {}]   ;;  %s3311_s2 = inlined_call_operand.vmem [shape: f32[128,1], index: 2, kind: input, shape index: {}]   ;;  %s3312_s3 = inlined_call_operand.vmem [shape: f32[128,1], index: 3, kind: input, shape index: {}]   ;;  %s3313_s4 = inlined_call_operand.vmem [shape: f32[128,1], index: 4, kind: input, shape index: {}]   ;;  %s3314_s5 = inlined_call_operand.vmem [shape: f32[128,1], index: 5, kind: input, shape index: {}]   ;;  %s3315_s6 = inlined_call_operand.vmem [shape: f32[128,128], index: 6, kind: input, shape index: {}]   ;;  %s3316_s7 = inlined_call_operand.vmem [shape: f32[1,128], index: 7, kind: input, shape index: {}]   ;;  %s3317_s8 = inlined_call_operand.vmem [shape: f32[1,128], index: 8, kind: input, shape index: {}]   ;;  %s3318_s9 = inlined_call_operand.vmem [shape: f32[128,128], index: 9, kind: input, shape index: {}]   ;;  %s3319_s10 = inlined_call_operand.vmem [shape: f32[1,128], index: 10, kind: input, shape index: {}]   ;;  %s3320_s11 = inlined_call_operand.vmem [shape: f32[1,128], index: 11, kind: input, shape index: {}]   ;;  %s3321_s12 = inlined_call_operand.hbm [shape: f32[128,128], index: 12, kind: output, shape index: {}]  }
   0x1   :  { %v59_v0 = vld [vmem:[%s3311_s2 + $0x8] sm:$0xff]  ;;  %v58_v1 = vld [vmem:[%s3311_s2] sm:$0xff]  ;;  %1813 = vset.pattern.permute.xlu1 %v1900_v2  ;;  %1812 = vset.pattern.permute.xlu0 %v1900_v2  ;;  %v73_v4 = vld [vmem:[%s3311_s2 + $0x78] sm:$0xff] }
   0x2   :  { %145 = vperm.xlu1 %1813, %v59_v0   ;;  %140 = vperm.xlu0 %1812, %v58_v1   ;;  %v74_v3 = vld [vmem:[%s3312_s3] sm:$0xff]  ;;  %v76_v5 = vld [vmem:[%s3312_s3 + $0x10] sm:$0xff]  ;;  %v75_v6 = vld [vmem:[%s3312_s3 + $0x8] sm:$0xff] }
   0x3   :  { %v60_v7 = vld [vmem:[%s3311_s2 + $0x10] sm:$0xff]  ;;  %v42_v8 = vld [vmem:[%s3310_s1] sm:$0xff]  ;;  %v61_v9 = vld [vmem:[%s3311_s2 + $0x18] sm:$0xff] }
   0x4   :  { %v43_v10 = vld [vmem:[%s3310_s1 + $0x8] sm:$0xff]  ;;  %v78_v11 = vld [vmem:[%s3312_s3 + $0x20] sm:$0xff]  ;;  %v77_v12 = vld [vmem:[%s3312_s3 + $0x18] sm:$0xff] }
   0x5   :  { %v44_v13 = vld [vmem:[%s3310_s1 + $0x10] sm:$0xff]  ;;  %v105_v14 = vld [vmem:[%s3313_s4 + $0x78] sm:$0xff]  ;;  %v90_v17 = vld [vmem:[%s3313_s4] sm:$0xff] }
   0x6   :  { %271 = vperm.xlu1 %1813, %v74_v3   ;;  %215 = vperm.xlu0 %1812, %v73_v4   ;;  %v765_v15 = vld [vmem:[%s3315_s6 + $0x78] sm:$0xff]  ;;  %v764_v16 = vld [vmem:[%s3315_s6 + $0x70] sm:$0xff]  ;;  %v62_v18 = vld [vmem:[%s3311_s2 + $0x20] sm:$0xff] }
   0x7   :  { %1696 = vmatprep.subr.mxu0 %v765_v15  ;;  %v763_v19 = vld [vmem:[%s3315_s6 + $0x68] sm:$0xff]  ;;  %v762_v20 = vld [vmem:[%s3315_s6 + $0x60] sm:$0xff]  ;;  %v45_v22 = vld [vmem:[%s3310_s1 + $0x18] sm:$0xff] }
   0x8   :  { %1697 = vmatpush3.msra.mxu0 %v765_v15  ;;  %v63_v21 = vld [vmem:[%s3311_s2 + $0x28] sm:$0xff]  ;;  %v761_v23 = vld [vmem:[%s3315_s6 + $0x58] sm:$0xff] }
   0x9   :  { %1698 = vmatprep.subr.mxu0 %v764_v16 }
   0xa   :  { %281 = vperm.xlu1 %1813, %v76_v5   ;;  %276 = vperm.xlu0 %1812, %v75_v6  }
   0xb   :  { %1699 = vmatpush3.msra.mxu0 %v764_v16 }
   0xc   :  { %1700 = vmatprep.subr.mxu0 %v763_v19 }
   0xd   :  { %1701 = vmatpush3.msra.mxu0 %v763_v19 }
   0xe   :  { %150 = vperm.xlu1 %1813, %v60_v7   ;;  %592 = vperm.xlu0 %1812, %v42_v8  }
   0xf   :  { %1702 = vmatprep.subr.mxu0 %v762_v20 }
  0x12   :  { %155 = vperm.xlu1 %1813, %v61_v9   ;;  %597 = vperm.xlu0 %1812, %v43_v10  }
  0x16   :  { %291 = vperm.xlu1 %1813, %v78_v11   ;;  %286 = vperm.xlu0 %1812, %v77_v12  }
  0x1a   :  { %602 = vperm.xlu1 %1813, %v44_v13   ;;  %475 = vperm.xlu0 %1812, %v105_v14  }
  0x1e   :  { %400 = vperm.xlu1 %1813, %v90_v17   ;;  %160 = vperm.xlu0 %1812, %v62_v18  }
  0x1f   :  { %17 = vsyncpa [#allocation3], 0  ;;  %v79_v24 = vld [vmem:[%s3312_s3 + $0x28] sm:$0xff]  ;;  %1703 = vmatpush3.msra.mxu0 %v762_v20  ;;  %v760_v26 = vld [vmem:[%s3315_s6 + $0x50] sm:$0xff] }
  0x20   :  { %v107_v25 = vld [vmem:[%s3314_s5 + $0x8] sm:$0xff]  ;;  %1704 = vmatprep.subr.mxu0 %v761_v23  ;;  %v80_v28 = vld [vmem:[%s3312_s3 + $0x30] sm:$0xff]  ;;  %v758_v30 = vld [vmem:[%s3315_s6 + $0x40] sm:$0xff] }
  0x21   :  { %1705 = vmatpush3.msra.mxu0 %v761_v23  ;;  %v759_v27 = vld [vmem:[%s3315_s6 + $0x48] sm:$0xff]  ;;  %v108_v29 = vld [vmem:[%s3314_s5 + $0x10] sm:$0xff]  ;;  %v46_v31 = vld [vmem:[%s3310_s1 + $0x20] sm:$0xff] }
  0x22   :  { %165 = vperm.xlu1 %1813, %v63_v21   ;;  %607 = vperm.xlu0 %1812, %v45_v22   ;;  %v91_v32 = vld [vmem:[%s3313_s4 + $0x8] sm:$0xff]  ;;  %v757_v33 = vld [vmem:[%s3315_s6 + $0x38] sm:$0xff]  ;;  %v756_v34 = vld [vmem:[%s3315_s6 + $0x30] sm:$0xff] }
  0x23   :  { %1706 = vmatprep.subr.mxu0 %v760_v26  ;;  %v92_v35 = vld [vmem:[%s3313_s4 + $0x10] sm:$0xff]  ;;  %v755_v37 = vld [vmem:[%s3315_s6 + $0x28] sm:$0xff]  ;;  %v65_v38 = vld [vmem:[%s3311_s2 + $0x38] sm:$0xff] }
  0x24   :  { %1707 = vmatpush3.msra.mxu0 %v760_v26  ;;  %v64_v36 = vld [vmem:[%s3311_s2 + $0x30] sm:$0xff]  ;;  %v47_v39 = vld [vmem:[%s3310_s1 + $0x28] sm:$0xff]  ;;  %v754_v40 = vld [vmem:[%s3315_s6 + $0x20] sm:$0xff] }
  0x25   :  { %1708 = vmatprep.subr.mxu0 %v759_v27  ;;  %v753_v41 = vld [vmem:[%s3315_s6 + $0x18] sm:$0xff]  ;;  %v752_v44 = vld [vmem:[%s3315_s6 + $0x10] sm:$0xff]  ;;  %v82_v45 = vld [vmem:[%s3312_s3 + $0x40] sm:$0xff] }
  0x26   :  { %296 = vperm.xlu1 %1813, %v79_v24   ;;  %501 = vperm.xlu0 %1812, %v107_v25   ;;  %v81_v42 = vld [vmem:[%s3312_s3 + $0x38] sm:$0xff]  ;;  %v110_v46 = vld [vmem:[%s3314_s5 + $0x20] sm:$0xff]  ;;  %v751_v47 = vld [vmem:[%s3315_s6 + $0x8] sm:$0xff] }
  0x27   :  { %1709 = vmatpush3.msra.mxu0 %v759_v27  ;;  %v109_v43 = vld [vmem:[%s3314_s5 + $0x18] sm:$0xff]  ;;  %v750_v48 = vld [vmem:[%s3315_s6] sm:$0xff]  ;;  %v48_v49 = vld [vmem:[%s3310_s1 + $0x30] sm:$0xff] }
  0x28   :  { %1710 = vmatprep.subr.mxu0 %v758_v30  ;;  %v93_v50 = vld [vmem:[%s3313_s4 + $0x18] sm:$0xff]  ;;  %v94_v51 = vld [vmem:[%s3313_s4 + $0x20] sm:$0xff]  ;;  %v67_v53 = vld [vmem:[%s3311_s2 + $0x48] sm:$0xff] }
  0x29   :  { %1711 = vmatpush3.msra.mxu0 %v758_v30  ;;  %v66_v52 = vld [vmem:[%s3311_s2 + $0x40] sm:$0xff]  ;;  %v49_v54 = vld [vmem:[%s3310_s1 + $0x38] sm:$0xff]  ;;  %v83_v55 = vld [vmem:[%s3312_s3 + $0x48] sm:$0xff] }
  0x2a   :  { %301 = vperm.xlu1 %1813, %v80_v28   ;;  %506 = vperm.xlu0 %1812, %v108_v29   ;;  %v111_v56 = vld [vmem:[%s3314_s5 + $0x28] sm:$0xff]  ;;  %v84_v57 = vld [vmem:[%s3312_s3 + $0x50] sm:$0xff]  ;;  %v50_v59 = vld [vmem:[%s3310_s1 + $0x40] sm:$0xff] }
  0x2b   :  { %1712 = vmatprep.subr.mxu0 %v757_v33  ;;  %v112_v58 = vld [vmem:[%s3314_s5 + $0x30] sm:$0xff]  ;;  %v95_v60 = vld [vmem:[%s3313_s4 + $0x28] sm:$0xff]  ;;  %v69_v63 = vld [vmem:[%s3311_s2 + $0x58] sm:$0xff] }
  0x2c   :  { %1713 = vmatpush3.msra.mxu0 %v757_v33  ;;  %v96_v61 = vld [vmem:[%s3313_s4 + $0x30] sm:$0xff]  ;;  %v51_v0 = vld [vmem:[%s3310_s1 + $0x48] sm:$0xff]  ;;  %v85_v1 = vld [vmem:[%s3312_s3 + $0x58] sm:$0xff] }
  0x2d   :  { %1714 = vmatprep.subr.mxu0 %v756_v34  ;;  %v68_v62 = vld [vmem:[%s3311_s2 + $0x50] sm:$0xff]  ;;  %v113_v2 = vld [vmem:[%s3314_s5 + $0x38] sm:$0xff]  ;;  %v86_v3 = vld [vmem:[%s3312_s3 + $0x60] sm:$0xff] }
  0x2e   :  { %612 = vperm.xlu1 %1813, %v46_v31   ;;  %405 = vperm.xlu0 %1812, %v91_v32   ;;  %v114_v4 = vld [vmem:[%s3314_s5 + $0x40] sm:$0xff]  ;;  %v52_v5 = vld [vmem:[%s3310_s1 + $0x50] sm:$0xff]  ;;  %v97_v6 = vld [vmem:[%s3313_s4 + $0x38] sm:$0xff] }
  0x2f   :  { %1715 = vmatpush3.msra.mxu0 %v756_v34  ;;  %v98_v7 = vld [vmem:[%s3313_s4 + $0x40] sm:$0xff]  ;;  %v71_v9 = vld [vmem:[%s3311_s2 + $0x68] sm:$0xff]  ;;  %v53_v10 = vld [vmem:[%s3310_s1 + $0x58] sm:$0xff] }
  0x30   :  { %1716 = vmatprep.subr.mxu0 %v755_v37  ;;  %v70_v8 = vld [vmem:[%s3311_s2 + $0x60] sm:$0xff]  ;;  %v87_v11 = vld [vmem:[%s3312_s3 + $0x68] sm:$0xff]  ;;  %v88_v13 = vld [vmem:[%s3312_s3 + $0x70] sm:$0xff] }
  0x31   :  { %1717 = vmatpush3.msra.mxu0 %v755_v37  ;;  %v115_v12 = vld [vmem:[%s3314_s5 + $0x48] sm:$0xff]  ;;  %v116_v14 = vld [vmem:[%s3314_s5 + $0x50] sm:$0xff]  ;;  %v54_v15 = vld [vmem:[%s3310_s1 + $0x60] sm:$0xff] }
  0x32   :  { %410 = vperm.xlu1 %1813, %v92_v35   ;;  %170 = vperm.xlu0 %1812, %v64_v36   ;;  %v99_v16 = vld [vmem:[%s3313_s4 + $0x48] sm:$0xff]  ;;  %v100_v19 = vld [vmem:[%s3313_s4 + $0x50] sm:$0xff]  ;;  %v117_v23 = vld [vmem:[%s3314_s5 + $0x58] sm:$0xff] }
  0x33   :  { %1718 = vmatprep.subr.mxu0 %v754_v40  ;;  %v72_v20 = vld [vmem:[%s3311_s2 + $0x70] sm:$0xff]  ;;  %v55_v24 = vld [vmem:[%s3310_s1 + $0x68] sm:$0xff]  ;;  %v118_v27 = vld [vmem:[%s3314_s5 + $0x60] sm:$0xff] }
  0x34   :  { %1719 = vmatpush3.msra.mxu0 %v754_v40  ;;  %v89_v28 = vld [vmem:[%s3312_s3 + $0x78] sm:$0xff]  ;;  %v56_v31 = vld [vmem:[%s3310_s1 + $0x70] sm:$0xff]  ;;  %v102_v36 = vld [vmem:[%s3313_s4 + $0x60] sm:$0xff] }
  0x35   :  { %1720 = vmatprep.subr.mxu0 %v753_v41  ;;  %v101_v32 = vld [vmem:[%s3313_s4 + $0x58] sm:$0xff]  ;;  %v2271_v40 = vld [vmem:[%s3309_s0] sm:$0xff] }
  0x36   :  { %175 = vperm.xlu1 %1813, %v65_v38   ;;  %617 = vperm.xlu0 %1812, %v47_v39   ;;  %v57_v35 = vld [vmem:[%s3310_s1 + $0x78] sm:$0xff] }
  0x37   :  { %1721 = vmatpush3.msra.mxu0 %v753_v41  ;;  %v2262_v37 = vld [vmem:[%s3309_s0 + $0x78] sm:$0xff]  ;;  %v250_v41 = vlaneseq }
  0x38   :  { %1722 = vmatprep.subr.mxu0 %v752_v44 }
  0x39   :  { %1723 = vmatpush3.msra.mxu0 %v752_v44  ;;  %v119_v44 = vld [vmem:[%s3314_s5 + $0x68] sm:$0xff] }
  0x3a   :  { %306 = vperm.xlu1 %1813, %v81_v42   ;;  %511 = vperm.xlu0 %1812, %v109_v43   ;;  %v120_v43 = vld [vmem:[%s3314_s5 + $0x70] sm:$0xff] }
  0x3b   :  { %1724 = vmatprep.subr.mxu0 %v751_v47 }
  0x3c   :  { %1725 = vmatpush3.msra.mxu0 %v751_v47 }
  0x3d   :  { %1726 = vmatprep.subr.mxu0 %v750_v48 }
  0x3e   :  { %311 = vperm.xlu1 %1813, %v82_v45   ;;  %516 = vperm.xlu0 %1812, %v110_v46   ;;  %v2286_v45 = vld [vmem:[%s3309_s0 + $0x8] sm:$0xff] }
  0x3f   :  { %1727 = vmatpush3.msra.mxu0 %v750_v48 }
  0x42   :  { %622 = vperm.xlu1 %1813, %v48_v49   ;;  %415 = vperm.xlu0 %1812, %v93_v50   ;;  %v2294_v49 = vshrl.u32 %v250_v41, 7  ;;  %v125_v41 = vld [vmem:[%s3309_s0 + $0x18] sm:$0xff] }
  0x44   :  { %vm252_vm0 = vcmp.lt.s32.totalorder %v2294_v49, 1  ;;  %vm381_vm1 = vcmp.lt.s32.totalorder %v2294_v49, 7  ;;  %v1630_v49 = vld [vmem:[%s3319_s10] ss:$0 sm:$0xff] }
  0x46   :  { %420 = vperm.xlu1 %1813, %v94_v51   ;;  %180 = vperm.xlu0 %1812, %v66_v52  }
  0x4a   :  { %185 = vperm.xlu1 %1813, %v67_v53   ;;  %627 = vperm.xlu0 %1812, %v49_v54   ;;  %v104_v53 = vld [vmem:[%s3313_s4 + $0x70] sm:$0xff]  ;;  %v103_v54 = vld [vmem:[%s3313_s4 + $0x68] sm:$0xff] }
  0x4e   :  { %316 = vperm.xlu1 %1813, %v83_v55   ;;  %521 = vperm.xlu0 %1812, %v111_v56   ;;  %v2312_v55 = vld [vmem:[%s3309_s0 + $0x10] sm:$0xff] }
  0x52   :  { %321 = vperm.xlu1 %1813, %v84_v57   ;;  %526 = vperm.xlu0 %1812, %v112_v58  }
  0x56   :  { %632 = vperm.xlu1 %1813, %v50_v59   ;;  %425 = vperm.xlu0 %1812, %v95_v60  }
  0x5a   :  { %430 = vperm.xlu1 %1813, %v96_v61   ;;  %190 = vperm.xlu0 %1812, %v68_v62  }
  0x5e   :  { %195 = vperm.xlu1 %1813, %v69_v63   ;;  %637 = vperm.xlu0 %1812, %v51_v0  }
  0x62   :  { %326 = vperm.xlu1 %1813, %v85_v1   ;;  %531 = vperm.xlu0 %1812, %v113_v2   ;;  %v106_v1 = vld [vmem:[%s3314_s5] sm:$0xff]  ;;  %v121_v2 = vld [vmem:[%s3314_s5 + $0x78] sm:$0xff] }
  0x66   :  { %331 = vperm.xlu1 %1813, %v86_v3   ;;  %536 = vperm.xlu0 %1812, %v114_v4  }
  0x6a   :  { %642 = vperm.xlu1 %1813, %v52_v5   ;;  %435 = vperm.xlu0 %1812, %v97_v6  }
  0x6e   :  { %440 = vperm.xlu1 %1813, %v98_v7   ;;  %200 = vperm.xlu0 %1812, %v70_v8  }
  0x72   :  { %205 = vperm.xlu1 %1813, %v71_v9   ;;  %647 = vperm.xlu0 %1812, %v53_v10  }
  0x76   :  { %336 = vperm.xlu1 %1813, %v87_v11   ;;  %541 = vperm.xlu0 %1812, %v115_v12  }
  0x7a   :  { %341 = vperm.xlu1 %1813, %v88_v13   ;;  %546 = vperm.xlu0 %1812, %v116_v14  }
  0x7d   :  { %v2209_v17 = vpop.permute.xlu1 %145  ;;  %v2211_v18 = vpop.permute.xlu0 %140 }
  0x7e   :  { %652 = vperm.xlu1 %1813, %v54_v15   ;;  %445 = vperm.xlu0 %1812, %v99_v16   ;;  %v218_v46 = vmul.f32 %v2211_v18, %v2271_v40  ;;  %v2298_v50 = vmul.f32 %v2209_v17, %v2286_v45 }
  0x80   :  { %v234_v57 = vrot.slane %v218_v46, 7  ;;  %v235_v61 = vrot.slane %v2298_v50, 7 }
  0x81   :  { %v2219_v21 = vpop.permute.xlu1 %271  ;;  %v2221_v22 = vpop.permute.xlu0 %215 }
  0x82   :  { %3383 = vst [vmem:[#allocation5_spill] sm:$0xff] %v2221_v22  ;;  %450 = vperm.xlu1 %1813, %v100_v19   ;;  %210 = vperm.xlu0 %1812, %v72_v20   ;;  %v2275_v42 = vmul.f32 %v2221_v22, %v2262_v37  ;;  %v2318_v58 = vmul.f32 %v2219_v21, %v2271_v40 }
  0x83   :  { %v267_v10 = vsel %vm252_vm0, %v234_v57, %v235_v61 }
  0x84   :  { %v3323_v51 = vrot.slane %v2275_v42, 7  ;;  %v3322_v5 = vrot.slane %v2318_v58, 1 }
  0x85   :  { %v2229_v25 = vpop.permute.xlu1 %281  ;;  %v2231_v26 = vpop.permute.xlu0 %276 }
  0x86   :  { %551 = vperm.xlu1 %1813, %v117_v23   ;;  %657 = vperm.xlu0 %1812, %v55_v24   ;;  %v350_v52 = vmul.f32 %v2231_v26, %v2286_v45  ;;  %v351_v62 = vmul.f32 %v2229_v25, %v2312_v55  ;;  %v268_v0 = vsel %vm252_vm0, %v3323_v51, %v234_v57 }
  0x88   :  { %v366_v63 = vrot.slane %v350_v52, 1  ;;  %v367_v9 = vrot.slane %v351_v62, 1 }
  0x89   :  { %v2239_v29 = vpop.permute.xlu1 %150  ;;  %v2241_v30 = vpop.permute.xlu0 %592 }
  0x8a   :  { %556 = vperm.xlu1 %1813, %v118_v27   ;;  %346 = vperm.xlu0 %1812, %v89_v28   ;;  %v670_v56 = vmul.f32 %v2241_v30, %v2271_v40  ;;  %v396_v11 = vsel %vm381_vm1, %v3322_v5, %v366_v63  ;;  %v395_v23 = vsel %vm381_vm1, %v366_v63, %v367_v9 }
  0x8c   :  { %v686_v3 = vadd.f32 %v670_v56, %v268_v0 }
  0x8d   :  { %v2249_v33 = vpop.permute.xlu1 %155  ;;  %v2251_v34 = vpop.permute.xlu0 %597 }
  0x8e   :  { %3384 = vst [vmem:[#allocation6_spill] sm:$0xff] %v2249_v33  ;;  %662 = vperm.xlu1 %1813, %v56_v31   ;;  %455 = vperm.xlu0 %1812, %v101_v32   ;;  %v671_v4 = vmul.f32 %v2251_v34, %v2286_v45  ;;  %v702_v13 = vadd.f32 %v686_v3, %v396_v11 }
  0x8f   :  { %v221_v52 = vmul.f32 %v2249_v33, %v125_v41 }
  0x90   :  { %v687_v12 = vadd.f32 %v671_v4, %v267_v10 }
  0x91   :  { %v2264_v38 = vpop.permute.xlu1 %291  ;;  %v2266_v39 = vpop.permute.xlu0 %286  ;;  %v237_v63 = vrot.slane %v221_v52, 7 }
  0x92   :  { %3385 = vst [vmem:[#allocation7_spill] sm:$0xff] %v2266_v39  ;;  %667 = vperm.xlu1 %1813, %v57_v35   ;;  %460 = vperm.xlu0 %1812, %v102_v36   ;;  %v703_v24 = vadd.f32 %v687_v12, %v395_v23  ;;  %v220_v36 = vmul.f32 %v2239_v29, %v2312_v55 }
  0x94   :  { %v236_v50 = vrot.slane %v220_v36, 7 }
  0x95   :  { %v2290_v47 = vpop.permute.xlu1 %602  ;;  %v2292_v48 = vpop.permute.xlu0 %475 }
  0x96   :  { %3386 = vst [vmem:[#allocation8_spill] sm:$0xff] %v2292_v48  ;;  %566 = vperm.xlu1 %1813, %v120_v43   ;;  %561 = vperm.xlu0 %1812, %v119_v44   ;;  %v493_v8 = vmul.f32 %v2292_v48, %v2262_v37  ;;  %v672_v56 = vmul.f32 %v2290_v47, %v2312_v55 }
  0x98   :  { %v718_v20 = vadd.f32 %v702_v13, %v493_v8  ;;  %v265_v13 = vsel %vm252_vm0, %v236_v50, %v237_v63 }
  0x99   :  { %v2320_v59 = vpop.permute.xlu1 %400  ;;  %v2322_v60 = vpop.permute.xlu0 %160 }
  0x9a   :  { %470 = vperm.xlu1 %1813, %v104_v53   ;;  %465 = vperm.xlu0 %1812, %v103_v54   ;;  %v478_v16 = vmul.f32 %v2320_v59, %v2271_v40  ;;  %v352_v53 = vmul.f32 %v2266_v39, %v125_v41  ;;  %v126_v54 = vld [vmem:[%s3309_s0 + $0x20] sm:$0xff] }
  0x9b   :  { %v353_v0 = vmul.f32 %v2264_v38, %v126_v54 }
  0x9c   :  { %v719_v32 = vadd.f32 %v703_v24, %v478_v16 }
  0x9d   :  { %v2342_v6 = vpop.permute.xlu1 %165  ;;  %v2344_v7 = vpop.permute.xlu0 %607  ;;  %v369_v12 = vrot.slane %v353_v0, 1 }
  0x9e   :  { %3387 = vst [vmem:[#allocation9_spill] sm:$0xff] %v2342_v6  ;;  %3388 = vst [vmem:[#allocation10_spill] sm:$0xff] %v2344_v7  ;;  %496 = vperm.xlu1 %1813, %v106_v1   ;;  %571 = vperm.xlu0 %1812, %v121_v2   ;;  %v368_v1 = vrot.slane %v352_v53, 1  ;;  %v266_v2 = vsel %vm252_vm0, %v235_v61, %v236_v50  ;;  %v673_v4 = vmul.f32 %v2344_v7, %v125_v41 }
  0x9f   :  { %v688_v3 = vadd.f32 %v672_v56, %v266_v2  ;;  %v222_v53 = vmul.f32 %v2322_v60, %v126_v54 }
  0xa0   :  { %v394_v16 = vsel %vm381_vm1, %v367_v9, %v368_v1 }
  0xa1   :  { %v2354_v14 = vpop.permute.xlu1 %296  ;;  %v2356_v15 = vpop.permute.xlu0 %501  ;;  %v238_v2 = vrot.slane %v222_v53, 7 }
  0xa2   :  { %3389 = vst [vmem:[#allocation11_spill] sm:$0xff] %v2354_v14  ;;  %v575_v19 = vmul.f32 %v2356_v15, %v2286_v45 }
  0xa4   :  { %v734_v27 = vadd.f32 %v718_v20, %v575_v19  ;;  %v689_v19 = vadd.f32 %v673_v4, %v265_v13  ;;  %v704_v20 = vadd.f32 %v688_v3, %v394_v16 }
  0xa5   :  { %v2364_v28 = vpop.permute.xlu1 %301  ;;  %v2366_v31 = vpop.permute.xlu0 %506 }
  0xa6   :  { %v576_v35 = vmul.f32 %v2366_v31, %v2312_v55  ;;  %1728 = vmatprep.mubr.f32.mxu0 %v734_v27 }
  0xa8   :  { %v735_v43 = vadd.f32 %v719_v32, %v576_v35 }
  0xa9   :  { %v2375_v44 = vpop.permute.xlu1 %612  ;;  %v2377_v46 = vpop.permute.xlu0 %405 }
  0xaa   :  { %1729 = vmatmul.mubr.f32.vlgmr.msra.gmra.mxu0 %v735_v43  ;;  %v479_v11 = vmul.f32 %v2377_v46, %v2286_v45  ;;  %v393_v45 = vsel %vm381_vm1, %v368_v1, %v369_v12  ;;  %v674_v13 = vmul.f32 %v2375_v44, %v126_v54 }
  0xab   :  { %v705_v35 = vadd.f32 %v689_v19, %v393_v45 }
  0xac   :  { %v720_v24 = vadd.f32 %v704_v20, %v479_v11  ;;  %v128_v11 = vld [vmem:[%s3309_s0 + $0x30] sm:$0xff] }
  0xad   :  { %v2386_v57 = vpop.permute.xlu1 %410  ;;  %v2388_v62 = vpop.permute.xlu0 %170 }
  0xae   :  { %v480_v27 = vmul.f32 %v2386_v57, %v2312_v55  ;;  %v127_v55 = vld [vmem:[%s3309_s0 + $0x28] sm:$0xff] }
  0xaf   :  { %v223_v3 = vmul.f32 %v2342_v6, %v127_v55  ;;  %v354_v4 = vmul.f32 %v2354_v14, %v127_v55 }
  0xb0   :  { %v721_v50 = vadd.f32 %v705_v35, %v480_v27  ;;  %v355_v27 = vmul.f32 %v2364_v28, %v128_v11 }
  0xb1   :  { %v2394_v8 = vpop.permute.xlu1 %175  ;;  %v2396_v10 = vpop.permute.xlu0 %617  ;;  %v239_v20 = vrot.slane %v223_v3, 7 }
  0xb2   :  { %3390 = vst [vmem:[#allocation12_spill] sm:$0xff] %v2394_v8  ;;  %3391 = vst [vmem:[#allocation13_spill] sm:$0xff] %v2396_v10  ;;  %v675_v35 = vmul.f32 %v2396_v10, %v127_v55  ;;  %v371_v53 = vrot.slane %v355_v27, 1 }
  0xb5   :  { %v2404_v61 = vpop.permute.xlu1 %306  ;;  %v2406_v23 = vpop.permute.xlu0 %511 }
  0xb6   :  { %3392 = vst [vmem:[#allocation14_spill] sm:$0xff] %v2404_v61  ;;  %3393 = vst [vmem:[#allocation15_spill] sm:$0xff] %v2406_v23  ;;  %v577_v32 = vmul.f32 %v2406_v23, %v125_v41 }
  0xb8   :  { %v736_v36 = vadd.f32 %v720_v24, %v577_v32  ;;  %v370_v24 = vrot.slane %v354_v4, 1  ;;  %v264_v32 = vsel %vm252_vm0, %v237_v63, %v238_v2 }
  0xb9   :  { %v2413_v43 = vpop.permute.xlu1 %311  ;;  %v2415_v9 = vpop.permute.xlu0 %516  ;;  %v690_v45 = vadd.f32 %v674_v13, %v264_v32 }
  0xba   :  { %v578_v52 = vmul.f32 %v2415_v9, %v126_v54  ;;  %1731 = vmatprep.mubr.f32.mxu0 %v736_v36  ;;  %v392_v3 = vsel %vm381_vm1, %v369_v12, %v370_v24 }
  0xbb   :  { %v706_v5 = vadd.f32 %v690_v45, %v392_v3 }
  0xbc   :  { %v737_v56 = vadd.f32 %v721_v50, %v578_v52 }
  0xbd   :  { %v2422_v0 = vpop.permute.xlu1 %622  ;;  %v2424_v1 = vpop.permute.xlu0 %415 }
  0xbe   :  { %3394 = vst [vmem:[#allocation16_spill] sm:$0xff] %v2424_v1  ;;  %1732 = vmatmul.mubr.f32.gmra.mxu0 %v737_v56  ;;  %v481_v52 = vmul.f32 %v2424_v1, %v125_v41  ;;  %v263_v56 = vsel %vm252_vm0, %v238_v2, %v239_v20  ;;  %v391_v41 = vsel %vm381_vm1, %v370_v24, %v371_v53 }
  0xbf   :  { %v691_v4 = vadd.f32 %v675_v35, %v263_v56  ;;  %v224_v35 = vmul.f32 %v2388_v62, %v128_v11 }
  0xc0   :  { %v722_v13 = vadd.f32 %v706_v5, %v481_v52  ;;  %v129_v5 = vld [vmem:[%s3309_s0 + $0x38] sm:$0xff] }
  0xc1   :  { %v2432_v16 = vpop.permute.xlu1 %420  ;;  %v2434_v19 = vpop.permute.xlu0 %180  ;;  %v707_v27 = vadd.f32 %v691_v4, %v391_v41  ;;  %v225_v56 = vmul.f32 %v2394_v8, %v129_v5  ;;  %v356_v3 = vmul.f32 %v2404_v61, %v129_v5  ;;  %v676_v4 = vmul.f32 %v2422_v0, %v128_v11 }
  0xc2   :  { %v482_v32 = vmul.f32 %v2432_v16, %v126_v54 }
  0xc3   :  { %v241_v41 = vrot.slane %v225_v56, 7 }
  0xc4   :  { %v723_v12 = vadd.f32 %v707_v27, %v482_v32  ;;  %v372_v27 = vrot.slane %v356_v3, 1 }
  0xc5   :  { %v2440_v36 = vpop.permute.xlu1 %185  ;;  %v2442_v50 = vpop.permute.xlu0 %627 }
  0xc6   :  { %3395 = vst [vmem:[#allocation17_spill] sm:$0xff] %v2440_v36  ;;  %3396 = vst [vmem:[#allocation18_spill] sm:$0xff] %v2442_v50  ;;  %v390_v56 = vsel %vm381_vm1, %v371_v53, %v372_v27 }
  0xc9   :  { %v2449_v51 = vpop.permute.xlu1 %316  ;;  %v2451_v63 = vpop.permute.xlu0 %521 }
  0xca   :  { %3397 = vst [vmem:[#allocation19_spill] sm:$0xff] %v2449_v51  ;;  %3398 = vst [vmem:[#allocation20_spill] sm:$0xff] %v2451_v63  ;;  %v579_v10 = vmul.f32 %v2451_v63, %v127_v55 }
  0xcc   :  { %v738_v1 = vadd.f32 %v722_v13, %v579_v10  ;;  %v240_v10 = vrot.slane %v224_v35, 7 }
  0xcd   :  { %v2457_v2 = vpop.permute.xlu1 %321  ;;  %v2459_v6 = vpop.permute.xlu0 %526 }
  0xce   :  { %3399 = vst [vmem:[#allocation21_spill] sm:$0xff] %v2457_v2  ;;  %v580_v45 = vmul.f32 %v2459_v6, %v128_v11  ;;  %1734 = vmatprep.mubr.f32.mxu0 %v738_v1  ;;  %v130_v1 = vld [vmem:[%s3309_s0 + $0x40] sm:$0xff]  ;;  %v261_v7 = vsel %vm252_vm0, %v240_v10, %v241_v41 }
  0xd0   :  { %v739_v54 = vadd.f32 %v723_v12, %v580_v45  ;;  %v357_v12 = vmul.f32 %v2413_v43, %v130_v1  ;;  %v262_v45 = vsel %vm252_vm0, %v239_v20, %v240_v10 }
  0xd1   :  { %v2466_v52 = vpop.permute.xlu1 %632  ;;  %v2468_v24 = vpop.permute.xlu0 %425  ;;  %v692_v35 = vadd.f32 %v676_v4, %v262_v45 }
  0xd2   :  { %3400 = vst [vmem:[#allocation22_spill] sm:$0xff] %v2466_v52  ;;  %3401 = vst [vmem:[#allocation23_spill] sm:$0xff] %v2468_v24  ;;  %1735 = vmatmul.mubr.f32.gmra.mxu0 %v739_v54  ;;  %v677_v54 = vmul.f32 %v2442_v50, %v129_v5  ;;  %v483_v63 = vmul.f32 %v2468_v24, %v127_v55  ;;  %v373_v14 = vrot.slane %v357_v12, 1 }
  0xd3   :  { %v708_v23 = vadd.f32 %v692_v35, %v390_v56  ;;  %v226_v35 = vmul.f32 %v2434_v19, %v130_v1 }
  0xd4   :  { %v693_v3 = vadd.f32 %v677_v54, %v261_v7  ;;  %v389_v55 = vsel %vm381_vm1, %v372_v27, %v373_v14 }
  0xd5   :  { %v2476_v13 = vpop.permute.xlu1 %430  ;;  %v2478_v32 = vpop.permute.xlu0 %190  ;;  %v724_v4 = vadd.f32 %v708_v23, %v483_v63  ;;  %v131_v23 = vld [vmem:[%s3309_s0 + $0x48] sm:$0xff] }
  0xd6   :  { %v484_v45 = vmul.f32 %v2476_v13, %v128_v11  ;;  %v709_v12 = vadd.f32 %v693_v3, %v389_v55  ;;  %v227_v54 = vmul.f32 %v2440_v36, %v131_v23  ;;  %v358_v56 = vmul.f32 %v2449_v51, %v131_v23 }
  0xd7   :  { %v678_v3 = vmul.f32 %v2466_v52, %v130_v1 }
  0xd8   :  { %v725_v7 = vadd.f32 %v709_v12, %v484_v45  ;;  %v243_v55 = vrot.slane %v227_v54, 7  ;;  %v374_v12 = vrot.slane %v358_v56, 1 }
  0xd9   :  { %v2484_v8 = vpop.permute.xlu1 %195  ;;  %v2486_v61 = vpop.permute.xlu0 %637 }
  0xda   :  { %3402 = vst [vmem:[#allocation24_spill] sm:$0xff] %v2484_v8  ;;  %3403 = vst [vmem:[#allocation25_spill] sm:$0xff] %v2486_v61  ;;  %v388_v54 = vsel %vm381_vm1, %v373_v14, %v374_v12  ;;  %v2549_v14 = vld [vmem:[%s3309_s0 + $0x58] sm:$0xff] }
  0xdd   :  { %v2493_v33 = vpop.permute.xlu1 %326  ;;  %v2495_v20 = vpop.permute.xlu0 %531 }
  0xde   :  { %3404 = vst [vmem:[#allocation26_spill] sm:$0xff] %v2493_v33  ;;  %3405 = vst [vmem:[#allocation27_spill] sm:$0xff] %v2495_v20  ;;  %v581_v50 = vmul.f32 %v2495_v20, %v129_v5 }
  0xe0   :  { %v740_v24 = vadd.f32 %v724_v4, %v581_v50  ;;  %v242_v50 = vrot.slane %v226_v35, 7 }
  0xe1   :  { %v2501_v10 = vpop.permute.xlu1 %331  ;;  %v2503_v48 = vpop.permute.xlu0 %536 }
  0xe2   :  { %3406 = vst [vmem:[#allocation28_spill] sm:$0xff] %v2501_v10  ;;  %v582_v53 = vmul.f32 %v2503_v48, %v130_v1  ;;  %1737 = vmatprep.mubr.f32.mxu0 %v740_v24  ;;  %v132_v24 = vld [vmem:[%s3309_s0 + $0x50] sm:$0xff]  ;;  %v259_v22 = vsel %vm252_vm0, %v242_v50, %v243_v55 }
  0xe4   :  { %v741_v11 = vadd.f32 %v725_v7, %v582_v53  ;;  %v359_v7 = vmul.f32 %v2457_v2, %v132_v24  ;;  %v260_v53 = vsel %vm252_vm0, %v241_v41, %v242_v50 }
  0xe5   :  { %v2510_v63 = vpop.permute.xlu1 %642  ;;  %v2512_v27 = vpop.permute.xlu0 %435  ;;  %v694_v35 = vadd.f32 %v678_v3, %v260_v53 }
  0xe6   :  { %3407 = vst [vmem:[#allocation29_spill] sm:$0xff] %v2510_v63  ;;  %3408 = vst [vmem:[#allocation30_spill] sm:$0xff] %v2512_v27  ;;  %1738 = vmatmul.mubr.f32.gmra.mxu0 %v741_v11  ;;  %v679_v11 = vmul.f32 %v2486_v61, %v131_v23  ;;  %v485_v20 = vmul.f32 %v2512_v27, %v129_v5  ;;  %v375_v39 = vrot.slane %v359_v7, 1 }
  0xe7   :  { %v710_v2 = vadd.f32 %v694_v35, %v388_v54  ;;  %v228_v5 = vmul.f32 %v2478_v32, %v132_v24  ;;  %v229_v54 = vmul.f32 %v2484_v8, %v2549_v14 }
  0xe8   :  { %v695_v56 = vadd.f32 %v679_v11, %v259_v22  ;;  %v387_v7 = vsel %vm381_vm1, %v374_v12, %v375_v39  ;;  %v360_v12 = vmul.f32 %v2493_v33, %v2549_v14 }
  0xe9   :  { %v2520_v4 = vpop.permute.xlu1 %440  ;;  %v2522_v45 = vpop.permute.xlu0 %200  ;;  %v726_v3 = vadd.f32 %v710_v2, %v485_v20  ;;  %v244_v20 = vrot.slane %v228_v5, 7 }
  0xea   :  { %3409 = vst [vmem:[#allocation31_spill] sm:$0xff] %v2522_v45  ;;  %v486_v53 = vmul.f32 %v2520_v4, %v130_v1  ;;  %v711_v22 = vadd.f32 %v695_v56, %v387_v7  ;;  %v134_v56 = vld [vmem:[%s3309_s0 + $0x60] sm:$0xff]  ;;  %v376_v5 = vrot.slane %v360_v12, 1 }
  0xeb   :  { %v258_v8 = vsel %vm252_vm0, %v243_v55, %v244_v20 }
  0xec   :  { %v727_v2 = vadd.f32 %v711_v22, %v486_v53  ;;  %v245_v22 = vrot.slane %v229_v54, 7  ;;  %v386_v12 = vsel %vm381_vm1, %v375_v39, %v376_v5 }
  0xed   :  { %v2528_v36 = vpop.permute.xlu1 %205  ;;  %v2530_v51 = vpop.permute.xlu0 %647 }
  0xee   :  { %3410 = vst [vmem:[#allocation32_spill] sm:$0xff] %v2528_v36  ;;  %3411 = vst [vmem:[#allocation33_spill] sm:$0xff] %v2530_v51  ;;  %v257_v54 = vsel %vm252_vm0, %v244_v20, %v245_v22 }
  0xf1   :  { %v2537_v52 = vpop.permute.xlu1 %336  ;;  %v2539_v41 = vpop.permute.xlu0 %541 }
  0xf2   :  { %3412 = vst [vmem:[#allocation34_spill] sm:$0xff] %v2537_v52  ;;  %3413 = vst [vmem:[#allocation35_spill] sm:$0xff] %v2539_v41  ;;  %v583_v61 = vmul.f32 %v2539_v41, %v131_v23  ;;  %v681_v41 = vmul.f32 %v2530_v51, %v2549_v14 }
  0xf4   :  { %v742_v50 = vadd.f32 %v726_v3, %v583_v61  ;;  %v680_v61 = vmul.f32 %v2510_v63, %v132_v24  ;;  %v697_v55 = vadd.f32 %v681_v41, %v257_v54 }
  0xf5   :  { %v2551_v35 = vpop.permute.xlu1 %341  ;;  %v2553_v11 = vpop.permute.xlu0 %546 }
  0xf6   :  { %3414 = vst [vmem:[#allocation36_spill] sm:$0xff] %v2551_v35  ;;  %v584_v1 = vmul.f32 %v2553_v11, %v132_v24  ;;  %1740 = vmatprep.mubr.f32.mxu0 %v742_v50  ;;  %v361_v50 = vmul.f32 %v2501_v10, %v134_v56  ;;  %v696_v33 = vadd.f32 %v680_v61, %v258_v8  ;;  %v2585_v8 = vld [vmem:[%s3309_s0 + $0x68] sm:$0xff] }
  0xf7   :  { %v231_v39 = vmul.f32 %v2528_v36, %v2585_v8  ;;  %v362_v36 = vmul.f32 %v2537_v52, %v2585_v8 }
  0xf8   :  { %v743_v3 = vadd.f32 %v727_v2, %v584_v1  ;;  %v377_v1 = vrot.slane %v361_v50, 1  ;;  %v712_v61 = vadd.f32 %v696_v33, %v386_v12  ;;  %v136_v33 = vld [vmem:[%s3309_s0 + $0x70] sm:$0xff] }
  0xf9   :  { %v2564_v7 = vpop.permute.xlu1 %652  ;;  %v2566_v53 = vpop.permute.xlu0 %445 }
  0xfa   :  { %3415 = vst [vmem:[#allocation37_spill] sm:$0xff] %v2564_v7  ;;  %3416 = vst [vmem:[#allocation38_spill] sm:$0xff] %v2566_v53  ;;  %1741 = vmatmul.mubr.f32.gmra.mxu0 %v743_v3  ;;  %v487_v2 = vmul.f32 %v2566_v53, %v131_v23  ;;  %v230_v23 = vmul.f32 %v2522_v45, %v134_v56  ;;  %v385_v10 = vsel %vm381_vm1, %v376_v5, %v377_v1 }
  0xfb   :  { %v713_v41 = vadd.f32 %v697_v55, %v385_v10  ;;  %v247_v45 = vrot.slane %v231_v39, 7  ;;  %v363_v5 = vmul.f32 %v2551_v35, %v136_v33 }
  0xfc   :  { %v728_v50 = vadd.f32 %v712_v61, %v487_v2 }
  0xfd   :  { %v2573_v27 = vpop.permute.xlu1 %450  ;;  %v2575_v63 = vpop.permute.xlu0 %210  ;;  %v379_v39 = vrot.slane %v363_v5, 1 }
  0xfe   :  { %3417 = vst [vmem:[#allocation39_spill] sm:$0xff] %v2573_v27  ;;  %3418 = vst [vmem:[#allocation40_spill] sm:$0xff] %v2575_v63  ;;  %v488_v53 = vmul.f32 %v2573_v27, %v132_v24  ;;  %v246_v24 = vrot.slane %v230_v23, 7  ;;  %v682_v27 = vmul.f32 %v2564_v7, %v134_v56  ;;  %v378_v23 = vrot.slane %v362_v36, 1 }
 0x100   :  { %v729_v61 = vadd.f32 %v713_v41, %v488_v53  ;;  %v256_v53 = vsel %vm252_vm0, %v245_v22, %v246_v24  ;;  %v232_v41 = vmul.f32 %v2575_v63, %v136_v33  ;;  %v384_v5 = vsel %vm381_vm1, %v377_v1, %v378_v23 }
 0x101   :  { %v2587_v3 = vpop.permute.xlu1 %551  ;;  %v2589_v51 = vpop.permute.xlu0 %657  ;;  %v698_v52 = vadd.f32 %v682_v27, %v256_v53  ;;  %v383_v27 = vsel %vm381_vm1, %v378_v23, %v379_v39 }
 0x102   :  { %3419 = vst [vmem:[#allocation41_spill] sm:$0xff] %v2587_v3  ;;  %3420 = vst [vmem:[#allocation42_spill] sm:$0xff] %v2589_v51  ;;  %v585_v20 = vmul.f32 %v2587_v3, %v2549_v14  ;;  %v683_v10 = vmul.f32 %v2589_v51, %v2585_v8  ;;  %v248_v22 = vrot.slane %v232_v41, 7 }
 0x104   :  { %v744_v54 = vadd.f32 %v728_v50, %v585_v20  ;;  %v254_v23 = vsel %vm252_vm0, %v247_v45, %v248_v22 }
 0x105   :  { %v2602_v12 = vpop.permute.xlu1 %556  ;;  %v2604_v2 = vpop.permute.xlu0 %346 }
 0x106   :  { %v586_v3 = vmul.f32 %v2602_v12, %v134_v56  ;;  %1743 = vmatprep.mubr.f32.mxu0 %v744_v54  ;;  %v255_v54 = vsel %vm252_vm0, %v246_v24, %v247_v45  ;;  %v364_v36 = vmul.f32 %v2604_v2, %v2262_v37  ;;  %v3430_v45 = vrot.slane %v2318_v58, 1 }
 0x107   :  { %v699_v35 = vadd.f32 %v683_v10, %v255_v54  ;;  %v714_v10 = vadd.f32 %v698_v52, %v384_v5  ;;  %v3427_v52 = vrot.slane %v2275_v42, 7 }
 0x108   :  { %v745_v55 = vadd.f32 %v729_v61, %v586_v3 }
 0x109   :  { %v2613_v50 = vpop.permute.xlu1 %662  ;;  %v2615_v20 = vpop.permute.xlu0 %455  ;;  %v715_v53 = vadd.f32 %v699_v35, %v383_v27  ;;  %v253_v35 = vsel %vm252_vm0, %v248_v22, %v3427_v52 }
 0x10a   :  { %3421 = vst [vmem:[#allocation43_spill] sm:$0xff] %v2613_v50  ;;  %3422 = vst [vmem:[#allocation44_spill] sm:$0xff] %v2615_v20  ;;  %1744 = vmatmul.mubr.f32.gmra.mxu0 %v745_v55  ;;  %v489_v61 = vmul.f32 %v2615_v20, %v2549_v14  ;;  %v684_v24 = vmul.f32 %v2613_v50, %v136_v33  ;;  %v380_v20 = vrot.slane %v364_v36, 1 }
 0x10c   :  { %v730_v41 = vadd.f32 %v714_v10, %v489_v61  ;;  %v700_v5 = vadd.f32 %v684_v24, %v254_v23  ;;  %v397_v42 = vsel %vm381_vm1, %v380_v20, %v3430_v45  ;;  %v382_v22 = vsel %vm381_vm1, %v379_v39, %v380_v20 }
 0x10d   :  { %v2622_v7 = vpop.permute.xlu1 %667  ;;  %v2624_v3 = vpop.permute.xlu0 %460 }
 0x10e   :  { %3423 = vst [vmem:[#allocation45_spill] sm:$0xff] %v2622_v7  ;;  %3424 = vst [vmem:[#allocation46_spill] sm:$0xff] %v2624_v3  ;;  %v490_v51 = vmul.f32 %v2624_v3, %v134_v56  ;;  %v685_v55 = vmul.f32 %v2622_v7, %v2262_v37  ;;  %v716_v24 = vadd.f32 %v700_v5, %v382_v22 }
 0x110   :  { %v731_v54 = vadd.f32 %v715_v53, %v490_v51  ;;  %v701_v27 = vadd.f32 %v685_v55, %v253_v35 }
 0x111   :  { %v2638_v14 = vpop.permute.xlu1 %566  ;;  %v2640_v56 = vpop.permute.xlu0 %561 }
 0x112   :  { %3425 = vst [vmem:[#allocation47_spill] sm:$0xff] %v2638_v14  ;;  %3426 = vst [vmem:[#allocation48_spill] sm:$0xff] %v2640_v56  ;;  %v588_v3 = vmul.f32 %v2638_v14, %v136_v33  ;;  %v587_v1 = vmul.f32 %v2640_v56, %v2585_v8 }
 0x114   :  { %v747_v7 = vadd.f32 %v731_v54, %v588_v3  ;;  %v746_v50 = vadd.f32 %v730_v41, %v587_v1  ;;  %v717_v3 = vadd.f32 %v701_v27, %v397_v42 }
 0x115   :  { %v2651_v61 = vpop.permute.xlu1 %470  ;;  %v2653_v51 = vpop.permute.xlu0 %465 }
 0x116   :  { %3428 = vst [vmem:[#allocation49_spill] sm:$0xff] %v2651_v61  ;;  %3429 = vst [vmem:[#allocation50_spill] sm:$0xff] %v2653_v51  ;;  %v492_v10 = vmul.f32 %v2651_v61, %v136_v33  ;;  %v491_v36 = vmul.f32 %v2653_v51, %v2585_v8  ;;  %1746 = vmatprep.mubr.f32.mxu0 %v746_v50 }
 0x117   :  { %1747 = vmatmul.mubr.f32.gmra.mxu0 %v747_v7  ;;  %v1628_v7 = vld [vmem:[%s3316_s7] ss:$0 sm:$0xff] }
 0x118   :  { %v733_v33 = vadd.f32 %v717_v3, %v492_v10  ;;  %v732_v41 = vadd.f32 %v716_v24, %v491_v36 }
 0x119   :  { %v2664_v55 = vpop.permute.xlu1 %496  ;;  %v2666_v53 = vpop.permute.xlu0 %571 }
 0x11a   :  { %3431 = vst [vmem:[#allocation51_spill] sm:$0xff] %v2664_v55  ;;  %3432 = vst [vmem:[#allocation52_spill] sm:$0xff] %v2666_v53  ;;  %v574_v8 = vmul.f32 %v2664_v55, %v2271_v40  ;;  %v589_v58 = vmul.f32 %v2666_v53, %v2262_v37 }
 0x11c   :  { %v749_v50 = vadd.f32 %v733_v33, %v574_v8  ;;  %v748_v54 = vadd.f32 %v732_v41, %v589_v58 }
 0x11e   :  { %1749 = vmatprep.mubr.f32.mxu0 %v748_v54 }
 0x11f   :  { %1750 = vmatmul.mubr.f32.gmra.mxu0 %v749_v50 }
 0x16a   :  { %v1730_v20 = vpop.f32.mrf.mxu0 }
 0x16b   :  { %v2677_v23 = vadd.f32 %v1730_v20, %v1628_v7 }
 0x16c   :  { %v839_v39 = vpop.f32.mrf.mxu0 }
 0x16d   :  { %v2675_v1 = vadd.f32 %v1628_v7, %v839_v39  ;;  %v919_v37 = vmul.f32 %v2677_v23, %v2677_v23 }
 0x16f   :  { %v918_v40 = vmul.f32 %v2675_v1, %v2675_v1 }
 0x171   :  { %934 = vadd.xlane.f32.xlu0 %v918_v40 }
 0x175   :  { %936 = vadd.xlane.f32.xlu0 %v919_v37 }
 0x17e   :  { %v1733_v52 = vpop.f32.mrf.mxu0 }
 0x180   :  { %v849_v35 = vpop.f32.mrf.mxu0 }
 0x181   :  { %v2683_v5 = vadd.f32 %v1628_v7, %v849_v35 }
 0x183   :  { %v920_v27 = vmul.f32 %v2683_v5, %v2683_v5 }
 0x185   :  { %938 = vadd.xlane.f32.xlu0 %v920_v27 }
 0x192   :  { %v1736_v10 = vpop.f32.mrf.mxu0 }
 0x194   :  { %v859_v36 = vpop.f32.mrf.mxu0 }
 0x195   :  { %v2687_v45 = vadd.f32 %v1628_v7, %v859_v36 }
 0x197   :  { %v922_v42 = vmul.f32 %v2687_v45, %v2687_v45 }
 0x199   :  { %942 = vadd.xlane.f32.xlu0 %v922_v42 }
 0x1a6   :  { %v1739_v22 = vpop.f32.mrf.mxu0 }
 0x1a8   :  { %v869_v3 = vpop.f32.mrf.mxu0 }
 0x1a9   :  { %v2691_v24 = vadd.f32 %v1628_v7, %v869_v3 }
 0x1ab   :  { %v924_v33 = vmul.f32 %v2691_v24, %v2691_v24 }
 0x1ad   :  { %946 = vadd.xlane.f32.xlu0 %v924_v33 }
 0x1ba   :  { %v1742_v41 = vpop.f32.mrf.mxu0 }
 0x1bc   :  { %v879_v8 = vpop.f32.mrf.mxu0 }
 0x1bd   :  { %v2695_v58 = vadd.f32 %v1628_v7, %v879_v8  ;;  %v2709_v8 = vadd.f32 %v1733_v52, %v1628_v7 }
 0x1bf   :  { %v926_v50 = vmul.f32 %v2695_v58, %v2695_v58 }
 0x1c1   :  { %950 = vadd.xlane.f32.xlu0 %v926_v50 }
 0x1ca   :  { %v1745_v54 = vpop.f32.mrf.mxu0 }
 0x1cb   :  { %v2729_v55 = vadd.f32 %v1745_v54, %v1628_v7  ;;  %v1291_v54 = vld [vmem:[%s3318_s9 + $0x70] sm:$0xff] }
 0x1cc   :  { %v889_v20 = vpop.f32.mrf.mxu0 }
 0x1cd   :  { %v2699_v39 = vadd.f32 %v1628_v7, %v889_v20  ;;  %3435 = vst [vmem:[#allocation55_spill] sm:$0xff] %v2729_v55 }
 0x1cf   :  { %v928_v40 = vmul.f32 %v2699_v39, %v2699_v39 }
 0x1d1   :  { %954 = vadd.xlane.f32.xlu0 %v928_v40 }
 0x1d7   :  { %v1748_v37 = vpop.f32.mrf.mxu0 }
 0x1d9   :  { %v899_v35 = vpop.f32.mrf.mxu0 }
 0x1da   :  { %v2703_v27 = vadd.f32 %v1628_v7, %v899_v35  ;;  %v2717_v35 = vadd.f32 %v1736_v10, %v1628_v7 }
 0x1dc   :  { %v930_v36 = vmul.f32 %v2703_v27, %v2703_v27  ;;  %v923_v52 = vmul.f32 %v2717_v35, %v2717_v35 }
 0x1de   :  { %958 = vadd.xlane.f32.xlu0 %v930_v36  ;;  %v921_v36 = vmul.f32 %v2709_v8, %v2709_v8 }
 0x1df   :  { %v1751_v42 = vpop.f32.mrf.mxu0 }
 0x1e0   :  { %v2707_v3 = vadd.f32 %v1751_v42, %v1628_v7  ;;  %v2721_v42 = vadd.f32 %v1739_v22, %v1628_v7  ;;  %v1292_v22 = vld [vmem:[%s3318_s9 + $0x78] sm:$0xff] }
 0x1e1   :  { %v909_v33 = vpop.f32.mrf.mxu0  ;;  %1752 = vmatprep.subr.mxu1 %v1292_v22 }
 0x1e2   :  { %v2711_v50 = vadd.f32 %v1628_v7, %v909_v33  ;;  %v933_v20 = vmul.f32 %v2707_v3, %v2707_v3  ;;  %3433 = vst [vmem:[#allocation53_spill] sm:$0xff] %v2721_v42  ;;  %v2725_v33 = vadd.f32 %v1742_v41, %v1628_v7  ;;  %v929_v41 = vmul.f32 %v2729_v55, %v2729_v55 }
 0x1e3   :  { %1753 = vmatpush3.msra.mxu1 %v1292_v22  ;;  %v1285_v22 = vld [vmem:[%s3318_s9 + $0x40] sm:$0xff] }
 0x1e4   :  { %964 = vadd.xlane.f32.xlu1 %v933_v20  ;;  %v932_v40 = vmul.f32 %v2711_v50, %v2711_v50  ;;  %3434 = vst [vmem:[#allocation54_spill] sm:$0xff] %v2725_v33  ;;  %v925_v20 = vmul.f32 %v2721_v42, %v2721_v42  ;;  %v927_v10 = vmul.f32 %v2725_v33, %v2725_v33 }
 0x1e5   :  { %1754 = vmatprep.subr.mxu1 %v1291_v54 }
 0x1e6   :  { %962 = vadd.xlane.f32.xlu0 %v932_v40  ;;  %v2736_v40 = vadd.f32 %v1748_v37, %v1628_v7  ;;  %1755 = vmatpush3.msra.mxu1 %v1291_v54  ;;  %v1289_v37 = vld [vmem:[%s3318_s9 + $0x60] sm:$0xff]  ;;  %v1283_v54 = vld [vmem:[%s3318_s9 + $0x30] sm:$0xff] }
 0x1e8   :  { %940 = vadd.xlane.f32.xlu1 %v921_v36  ;;  %3436 = vst [vmem:[#allocation56_spill] sm:$0xff] %v2736_v40  ;;  %v1290_v36 = vld [vmem:[%s3318_s9 + $0x68] sm:$0xff]  ;;  %v931_v7 = vmul.f32 %v2736_v40, %v2736_v40 }
 0x1e9   :  { %1756 = vmatprep.subr.mxu1 %v1290_v36 }
 0x1ea   :  { %1757 = vmatpush3.msra.mxu1 %v1290_v36  ;;  %v1282_v36 = vld [vmem:[%s3318_s9 + $0x28] sm:$0xff] }
 0x1eb   :  { %1758 = vmatprep.subr.mxu1 %v1289_v37 }
 0x1ec   :  { %944 = vadd.xlane.f32.xlu1 %v923_v52  ;;  %1759 = vmatpush3.msra.mxu1 %v1289_v37  ;;  %v1288_v52 = vld [vmem:[%s3318_s9 + $0x58] sm:$0xff] }
 0x1ed   :  { %1760 = vmatprep.subr.mxu1 %v1288_v52  ;;  %v1280_v37 = vld [vmem:[%s3318_s9 + $0x18] sm:$0xff] }
 0x1ee   :  { %1761 = vmatpush3.msra.mxu1 %v1288_v52  ;;  %v1279_v52 = vld [vmem:[%s3318_s9 + $0x10] sm:$0xff] }
 0x1f0   :  { %948 = vadd.xlane.f32.xlu1 %v925_v20  ;;  %v1287_v20 = vld [vmem:[%s3318_s9 + $0x50] sm:$0xff] }
 0x1f1   :  { %1762 = vmatprep.subr.mxu1 %v1287_v20 }
 0x1f2   :  { %1763 = vmatpush3.msra.mxu1 %v1287_v20  ;;  %v1278_v20 = vld [vmem:[%s3318_s9 + $0x8] sm:$0xff] }
 0x1f4   :  { %952 = vadd.xlane.f32.xlu1 %v927_v10  ;;  %v1286_v10 = vld [vmem:[%s3318_s9 + $0x48] sm:$0xff] }
 0x1f5   :  { %1764 = vmatprep.subr.mxu1 %v1286_v10 }
 0x1f6   :  { %1765 = vmatpush3.msra.mxu1 %v1286_v10  ;;  %v1277_v10 = vld [vmem:[%s3318_s9] sm:$0xff] }
 0x1f7   :  { %1766 = vmatprep.subr.mxu1 %v1285_v22 }
 0x1f8   :  { %956 = vadd.xlane.f32.xlu1 %v929_v41  ;;  %1767 = vmatpush3.msra.mxu1 %v1285_v22  ;;  %v1284_v41 = vld [vmem:[%s3318_s9 + $0x38] sm:$0xff] }
 0x1f9   :  { %1768 = vmatprep.subr.mxu1 %v1284_v41 }
 0x1fa   :  { %1769 = vmatpush3.msra.mxu1 %v1284_v41  ;;  %v935_v22 = vpop.xlane.xlu0 %934 }
 0x1fb   :  { %1770 = vmatprep.subr.mxu1 %v1283_v54 }
 0x1fc   :  { %960 = vadd.xlane.f32.xlu1 %v931_v7  ;;  %1771 = vmatpush3.msra.mxu1 %v1283_v54  ;;  %v1281_v7 = vld [vmem:[%s3318_s9 + $0x20] sm:$0xff] }
 0x1fd   :  { %1772 = vmatprep.subr.mxu1 %v1282_v36 }
 0x1fe   :  { %1773 = vmatpush3.msra.mxu1 %v1282_v36  ;;  %v937_v41 = vpop.xlane.xlu0 %936 }
 0x1ff   :  { %1774 = vmatprep.subr.mxu1 %v1281_v7  ;;  %v967_v36 = vmul.f32 0.0078125, %v937_v41 }
 0x200   :  { %1775 = vmatpush3.msra.mxu1 %v1281_v7  ;;  %v966_v7 = vmul.f32 0.0078125, %v935_v22 }
 0x201   :  { %1776 = vmatprep.subr.mxu1 %v1280_v37  ;;  %v983_v61 = vadd.f32 1e-12, %v967_v36 }
 0x202   :  { %1777 = vmatpush3.msra.mxu1 %v1280_v37 }
 0x203   :  { %1778 = vmatprep.subr.mxu1 %v1279_v52  ;;  %1814 = vrsqrt.f32 %v983_v61 }
 0x204   :  { %1779 = vmatpush3.msra.mxu1 %v1279_v52  ;;  %v982_v52 = vadd.f32 1e-12, %v966_v7 }
 0x205   :  { %1780 = vmatprep.subr.mxu1 %v1278_v20 }
 0x206   :  { %1781 = vmatpush3.msra.mxu1 %v1278_v20  ;;  %1816 = vrsqrt.f32 %v982_v52 }
 0x207   :  { %1782 = vmatprep.subr.mxu1 %v1277_v10 }
 0x208   :  { %1783 = vmatpush3.msra.mxu1 %v1277_v10 }
 0x20e   :  { %v939_v54 = vpop.xlane.xlu0 %938 }
 0x20f   :  { %v968_v37 = vmul.f32 0.0078125, %v939_v54 }
 0x210   :  { %v1815_v56 = vpop.eup %1814 }
 0x211   :  { %v984_v53 = vadd.f32 1e-12, %v968_v37  ;;  %v1015_v42 = vmul.f32 %v1815_v56, %v2677_v23 }
 0x213   :  { %1818 = vrsqrt.f32 %v984_v53  ;;  %v1817_v40 = vpop.eup %1816  ;;  %v2793_v53 = vld [vmem:[%s3317_s8] ss:$0 sm:$0xff] }
 0x214   :  { %v1014_v22 = vmul.f32 %v1817_v40, %v2675_v1 }
 0x220   :  { %v1819_v10 = vpop.eup %1818 }
 0x221   :  { %v1016_v54 = vmul.f32 %v1819_v10, %v2683_v5 }
 0x222   :  { %v943_v14 = vpop.xlane.xlu0 %942 }
 0x223   :  { %v970_v51 = vmul.f32 0.0078125, %v943_v14  ;;  %v1038_v14 = vmul.f32 %v2793_v53, %v1015_v42  ;;  %v1039_v56 = vmul.f32 %v2793_v53, %v1016_v54 }
 0x225   :  { %v986_v63 = vadd.f32 1e-12, %v970_v51  ;;  %v1037_v51 = vmul.f32 %v2793_v53, %v1014_v22  ;;  %v1054_v1 = vmax.f32 %v1038_v14, 0.0  ;;  %v2800_v5 = vmax.f32 %v1039_v56, 0.0 }
 0x227   :  { %1820 = vrsqrt.f32 %v986_v63  ;;  %v2809_v52 = vmul.f32 %v2800_v5, %v2229_v25 }
 0x229   :  { %3438 = vst [vmem:[#allocation58_spill] sm:$0xff] %v2809_v52 }
 0x236   :  { %v947_v20 = vpop.xlane.xlu0 %946 }
 0x237   :  { %v972_v55 = vmul.f32 0.0078125, %v947_v20  ;;  %v1821_v20 = vpop.eup %1820 }
 0x239   :  { %v988_v36 = vadd.f32 1e-12, %v972_v55  ;;  %v2798_v55 = vmax.f32 %v1037_v51, 0.0  ;;  %v2822_v51 = vmul.f32 %v2800_v5, %v2239_v29 }
 0x23b   :  { %1822 = vrsqrt.f32 %v988_v36  ;;  %3437 = vst [vmem:[#allocation57_spill] sm:$0xff] %v2798_v55  ;;  %v2805_v42 = vmul.f32 %v2798_v55, %v2211_v18 }
 0x23d   :  { %v3377_v54 = vrot.slane %v2805_v42, 7 }
 0x248   :  { %v1823_v36 = vpop.eup %1822 }
 0x24a   :  { %v951_v33 = vpop.xlane.xlu0 %950 }
 0x24b   :  { %v974_v41 = vmul.f32 0.0078125, %v951_v33  ;;  %v1070_v33 = vmul.f32 %v1054_v1, %v2209_v17  ;;  %v3376_v17 = vrot.slane %v2809_v52, 1 }
 0x24d   :  { %v990_v7 = vadd.f32 1e-12, %v974_v41  ;;  %v1118_v41 = vmul.f32 %v1054_v1, %v2231_v26  ;;  %v1086_v22 = vrot.slane %v1070_v33, 7  ;;  %v1198_v26 = vmul.f32 %v1054_v1, %v2251_v34 }
 0x24e   :  { %v2832_v34 = vmul.f32 %v2798_v55, %v2219_v21  ;;  %v2840_v21 = vmul.f32 %v2798_v55, %v2241_v30 }
 0x24f   :  { %1824 = vrsqrt.f32 %v990_v7  ;;  %v1134_v7 = vrot.slane %v1118_v41, 1  ;;  %v1115_v25 = vsel %vm252_vm0, %v3377_v54, %v1086_v22 }
 0x250   :  { %3439 = vst [vmem:[#allocation59_spill] sm:$0xff] %v2832_v34  ;;  %v3379_v52 = vrot.slane %v2832_v34, 1 }
 0x25a   :  { %v955_v61 = vpop.xlane.xlu0 %954 }
 0x25b   :  { %v976_v37 = vmul.f32 0.0078125, %v955_v61  ;;  %v1018_v61 = vmul.f32 %v1821_v20, %v2687_v45 }
 0x25c   :  { %v1825_v56 = vpop.eup %1824 }
 0x25d   :  { %v992_v23 = vadd.f32 1e-12, %v976_v37 }
 0x25f   :  { %1826 = vrsqrt.f32 %v992_v23  ;;  %v1020_v23 = vmul.f32 %v1823_v36, %v2691_v24  ;;  %v1022_v24 = vmul.f32 %v1825_v56, %v2695_v58  ;;  %v2848_v56 = vmul.f32 %v1054_v1, %v2377_v46 }
 0x260   :  { %v1199_v46 = vmul.f32 %v2800_v5, %v2290_v47 }
 0x267   :  { %v959_v63 = vpop.xlane.xlu0 %958 }
 0x268   :  { %v978_v40 = vmul.f32 0.0078125, %v959_v63  ;;  %v1162_v63 = vsel %vm381_vm1, %v1134_v7, %v3376_v17 }
 0x26a   :  { %v994_v10 = vadd.f32 1e-12, %v978_v40  ;;  %v1041_v40 = vmul.f32 %v2793_v53, %v1018_v61 }
 0x26c   :  { %1828 = vrsqrt.f32 %v994_v10  ;;  %v1214_v10 = vadd.f32 %v1198_v26, %v1115_v25  ;;  %v1057_v61 = vmax.f32 %v1041_v40, 0.0  ;;  %v1165_v25 = vmul.f32 %v2798_v55, %v2320_v59 }
 0x26d   :  { %v965_v14 = vpop.xlane.xlu1 %964  ;;  %v2845_v26 = vmul.f32 %v1054_v1, %v2356_v15  ;;  %v2860_v15 = vsel %vm381_vm1, %v3379_v52, %v1134_v7  ;;  %v3449_v52 = vrot.slane %v2805_v42, 7 }
 0x26e   :  { %v981_v18 = vmul.f32 0.0078125, %v965_v14  ;;  %v1230_v36 = vadd.f32 %v1214_v10, %v1162_v63  ;;  %v1087_v14 = vrot.slane %v2822_v51, 7  ;;  %v2874_v40 = vmul.f32 %v1057_v61, %v2322_v60 }
 0x26f   :  { %v963_v37 = vpop.xlane.xlu0 %962 }
 0x270   :  { %v997_v33 = vadd.f32 1e-12, %v981_v18  ;;  %v980_v45 = vmul.f32 0.0078125, %v963_v37  ;;  %v1827_v18 = vpop.eup %1826  ;;  %v1043_v37 = vmul.f32 %v2793_v53, %v1020_v23  ;;  %v1045_v23 = vmul.f32 %v2793_v53, %v1022_v24 }
 0x271   :  { %v941_v20 = vpop.xlane.xlu1 %940  ;;  %v1114_v30 = vsel %vm252_vm0, %v1086_v22, %v1087_v14  ;;  %v2871_v22 = vmul.f32 %v2800_v5, %v2386_v57  ;;  %v2886_v57 = vmul.f32 %v1057_v61, %v2375_v44 }
 0x272   :  { %1830 = vrsqrt.f32 %v997_v33  ;;  %v996_v29 = vadd.f32 1e-12, %v980_v45  ;;  %v969_v41 = vmul.f32 0.0078125, %v941_v20  ;;  %v1024_v33 = vmul.f32 %v1827_v18, %v2699_v39  ;;  %v3455_v18 = vld [vmem:[#allocation40_spill] sm:$0xff] }
 0x273   :  { %v1246_v45 = vadd.f32 %v1230_v36, %v1165_v25  ;;  %v1059_v63 = vmax.f32 %v1043_v37, 0.0  ;;  %v1183_v39 = vmul.f32 %v2800_v5, %v2366_v31  ;;  %v2877_v47 = vadd.f32 %v1199_v46, %v1114_v30  ;;  %v3440_v46 = vld [vmem:[#allocation22_spill] sm:$0xff] }
 0x274   :  { %1832 = vrsqrt.f32 %v996_v29  ;;  %v985_v17 = vadd.f32 1e-12, %v969_v41  ;;  %v1061_v10 = vmax.f32 %v1045_v23, 0.0  ;;  %v1047_v29 = vmul.f32 %v2793_v53, %v1024_v33 }
 0x275   :  { %v945_v54 = vpop.xlane.xlu1 %944  ;;  %v2880_v31 = vadd.f32 %v1246_v45, %v1183_v39  ;;  %v2889_v60 = vmul.f32 %v1059_v63, %v2364_v28  ;;  %v2901_v44 = vmul.f32 %v1059_v63, %v2459_v6  ;;  %v2904_v28 = vmul.f32 %v1059_v63, %v2422_v0  ;;  %v3454_v45 = vld [vmem:[#allocation15_spill] sm:$0xff] }
 0x276   :  { %1834 = vrsqrt.f32 %v985_v17  ;;  %v971_v58 = vmul.f32 0.0078125, %v945_v54  ;;  %v2867_v17 = vmul.f32 %v1057_v61, %v2264_v38  ;;  %v2883_v38 = vmul.f32 %v1057_v61, %v2415_v9 }
 0x277   :  { %v2898_v9 = vmul.f32 %v1057_v61, %v2432_v16  ;;  %v1063_v25 = vmax.f32 %v1047_v29, 0.0  ;;  %v2910_v23 = vmul.f32 %v1059_v63, %v2476_v13  ;;  %v2913_v33 = vmul.f32 %v1061_v10, %v2434_v19 }
 0x278   :  { %v987_v59 = vadd.f32 1e-12, %v971_v58  ;;  %v2907_v58 = vmul.f32 %v1061_v10, %v2413_v43  ;;  %v2921_v43 = vmul.f32 %v1061_v10, %v2503_v48  ;;  %v2924_v13 = vmul.f32 %v1061_v10, %v3440_v46  ;;  %v3445_v46 = vld [vmem:[#allocation31_spill] sm:$0xff] }
 0x279   :  { %v1829_v1 = vpop.eup %1828  ;;  %v949_v54 = vpop.xlane.xlu1 %948  ;;  %v2927_v19 = vmul.f32 %v1061_v10, %v2520_v4  ;;  %v2937_v29 = vmul.f32 %v1063_v25, %v2478_v32  ;;  %v3444_v32 = vld [vmem:[#allocation39_spill] sm:$0xff] }
 0x27a   :  { %v1026_v7 = vmul.f32 %v1829_v1, %v2703_v27  ;;  %1836 = vrsqrt.f32 %v987_v59  ;;  %v973_v20 = vmul.f32 0.0078125, %v949_v54  ;;  %v2892_v27 = vmul.f32 %v1059_v63, %v2388_v62 }
 0x27c   :  { %v989_v41 = vadd.f32 1e-12, %v973_v20  ;;  %v1049_v5 = vmul.f32 %v2793_v53, %v1026_v7  ;;  %v3441_v20 = vld [vmem:[#allocation21_spill] sm:$0xff]  ;;  %v3452_v7 = vld [vmem:[#allocation36_spill] sm:$0xff] }
 0x27d   :  { %v953_v24 = vpop.xlane.xlu1 %952  ;;  %v2934_v48 = vmul.f32 %v1063_v25, %v3441_v20 }
 0x27e   :  { %1838 = vrsqrt.f32 %v989_v41  ;;  %v975_v37 = vmul.f32 0.0078125, %v953_v24  ;;  %v2918_v30 = vmax.f32 %v1049_v5, 0.0  ;;  %v2944_v24 = vmul.f32 %v1063_v25, %v2553_v11 }
 0x27f   :  { %v1831_v62 = vpop.eup %1830 }
 0x280   :  { %v1029_v16 = vmul.f32 %v1831_v62, %v2707_v3  ;;  %v991_v61 = vadd.f32 1e-12, %v975_v37  ;;  %v3442_v37 = vld [vmem:[#allocation29_spill] sm:$0xff] }
 0x281   :  { %v1833_v0 = vpop.eup %1832  ;;  %v957_v59 = vpop.xlane.xlu1 %956  ;;  %v2947_v62 = vmul.f32 %v1063_v25, %v3442_v37 }
 0x282   :  { %v1028_v3 = vmul.f32 %v1833_v0, %v2711_v50  ;;  %1840 = vrsqrt.f32 %v991_v61  ;;  %v977_v63 = vmul.f32 0.0078125, %v957_v59  ;;  %v1052_v1 = vmul.f32 %v2793_v53, %v1029_v16  ;;  %v3443_v16 = vld [vmem:[#allocation28_spill] sm:$0xff] }
 0x283   :  { %v1835_v54 = vpop.eup %1834  ;;  %v2951_v61 = vmul.f32 %v2918_v30, %v3443_v16  ;;  %v2954_v0 = vmul.f32 %v1063_v25, %v3444_v32  ;;  %v3447_v32 = vld [vmem:[#allocation37_spill] sm:$0xff] }
 0x284   :  { %v1051_v4 = vmul.f32 %v2793_v53, %v1028_v3  ;;  %v1017_v10 = vmul.f32 %v1835_v54, %v2709_v8  ;;  %v993_v50 = vadd.f32 1e-12, %v977_v63  ;;  %v2941_v41 = vmax.f32 %v1052_v1, 0.0  ;;  %v3446_v1 = vld [vmem:[#allocation5_spill] sm:$0xff] }
 0x285   :  { %v961_v5 = vpop.xlane.xlu1 %960  ;;  %v2959_v3 = vmul.f32 %v2918_v30, %v3445_v46  ;;  %v2978_v46 = vmul.f32 %v2918_v30, %v3447_v32 }
 0x286   :  { %v1040_v59 = vmul.f32 %v2793_v53, %v1017_v10  ;;  %1842 = vrsqrt.f32 %v993_v50  ;;  %v979_v8 = vmul.f32 0.0078125, %v961_v5  ;;  %v2961_v63 = vmax.f32 %v1051_v4, 0.0  ;;  %v3450_v4 = vld [vmem:[#allocation8_spill] sm:$0xff] }
 0x287   :  { %v1837_v11 = vpop.eup %1836  ;;  %v2965_v54 = vmul.f32 %v2941_v41, %v3446_v1  ;;  %v2972_v5 = vmul.f32 %v2918_v30, %v2602_v12  ;;  %v2982_v1 = vmul.f32 %v2941_v41, %v2604_v2  ;;  %v1180_v20 = vmul.f32 %v2941_v41, %v3450_v4  ;;  %v3451_v2 = vld [vmem:[#allocation6_spill] sm:$0xff] }
 0x288   :  { %v1056_v37 = vmax.f32 %v1040_v59, 0.0  ;;  %v1019_v10 = vmul.f32 %v1837_v11, %v2717_v35  ;;  %v995_v50 = vadd.f32 1e-12, %v979_v8  ;;  %v3448_v35 = vld [vmem:[#allocation7_spill] sm:$0xff] }
 0x289   :  { %v3380_v16 = vrot.slane %v2965_v54, 7 }
 0x28a   :  { %v1042_v59 = vmul.f32 %v2793_v53, %v1019_v10  ;;  %1844 = vrsqrt.f32 %v995_v50  ;;  %v1120_v8 = vmul.f32 %v1056_v37, %v3448_v35  ;;  %v1072_v25 = vmul.f32 %v1056_v37, %v3451_v2  ;;  %v3453_v35 = vld [vmem:[#allocation53_spill] sm:$0xff] }
 0x28b   :  { %v1839_v11 = vpop.eup %1838  ;;  %v1116_v32 = vsel %vm252_vm0, %v3380_v16, %v3449_v52  ;;  %v2998_v10 = vmul.f32 %v2961_v63, %v3452_v7  ;;  %v1184_v6 = vmul.f32 %v1056_v37, %v3454_v45  ;;  %v3005_v52 = vmul.f32 %v2961_v63, %v3455_v18  ;;  %v3456_v16 = vld [vmem:[#allocation58_spill] sm:$0xff] }
 0x28c   :  { %v1058_v50 = vmax.f32 %v1042_v59, 0.0  ;;  %v1021_v12 = vmul.f32 %v1839_v11, %v3453_v35  ;;  %v1213_v39 = vadd.f32 %v2840_v21, %v1116_v32  ;;  %v1136_v42 = vrot.slane %v1120_v8, 1  ;;  %v3458_v21 = vld [vmem:[#allocation10_spill] sm:$0xff] }
 0x28d   :  { %v1088_v36 = vrot.slane %v1072_v25, 7  ;;  %v3457_v59 = vrot.slane %v3456_v16, 1  ;;  %v1200_v8 = vmul.f32 %v1056_v37, %v3458_v21  ;;  %v3459_v25 = vrot.slane %v2874_v40, 7 }
 0x28e   :  { %v1044_v2 = vmul.f32 %v2793_v53, %v1021_v12  ;;  %v1229_v7 = vadd.f32 %v1213_v39, %v2860_v15  ;;  %v3460_v39 = vld [vmem:[#allocation11_spill] sm:$0xff]  ;;  %v3461_v12 = vld [vmem:[#allocation54_spill] sm:$0xff]  ;;  %v3462_v21 = vrot.slane %v2867_v17, 1 }
 0x28f   :  { %v1161_v11 = vsel %vm381_vm1, %v3457_v59, %v1136_v42  ;;  %v1841_v32 = vpop.eup %1840  ;;  %v1113_v18 = vsel %vm252_vm0, %v1087_v14, %v1088_v36  ;;  %v1112_v15 = vsel %vm252_vm0, %v1088_v36, %v3459_v25  ;;  %v1122_v16 = vmul.f32 %v1058_v50, %v3460_v39  ;;  %v3463_v39 = vld [vmem:[#allocation9_spill] sm:$0xff] }
 0x290   :  { %v1231_v45 = vadd.f32 %v2877_v47, %v1161_v11  ;;  %v1023_v35 = vmul.f32 %v1841_v32, %v3461_v12  ;;  %v1245_v59 = vadd.f32 %v1229_v7, %v1180_v20  ;;  %v1160_v47 = vsel %vm381_vm1, %v1136_v42, %v3462_v21 }
 0x291   :  { %v1216_v11 = vadd.f32 %v1200_v8, %v1113_v18  ;;  %v1060_v51 = vmax.f32 %v1044_v2, 0.0  ;;  %v1138_v14 = vrot.slane %v1122_v16, 1  ;;  %v1217_v55 = vadd.f32 %v2886_v57, %v1112_v15  ;;  %v3465_v2 = vld [vmem:[#allocation16_spill] sm:$0xff] }
 0x292   :  { %v1247_v4 = vadd.f32 %v1231_v45, %v2848_v56  ;;  %v1046_v34 = vmul.f32 %v2793_v53, %v1023_v35  ;;  %v1261_v36 = vadd.f32 %v1245_v59, %v2845_v26  ;;  %v1074_v32 = vmul.f32 %v1058_v50, %v3463_v39  ;;  %v3466_v45 = vld [vmem:[#allocation55_spill] sm:$0xff]  ;;  %v3467_v26 = vld [vmem:[#allocation20_spill] sm:$0xff]  ;;  %v3469_v59 = vld [vmem:[#allocation14_spill] sm:$0xff] }
 0x293   :  { %v1232_v25 = vadd.f32 %v1216_v11, %v1160_v47  ;;  %v1843_v20 = vpop.eup %1842  ;;  %v3464_v12 = vmov %v3462_v21  ;;  %v1168_v8 = vmul.f32 %v1056_v37, %v3465_v2  ;;  %v1147_v56 = vrot.slane %v2998_v10, 1 }
 0x294   :  { %v1263_v7 = vadd.f32 %v1247_v4, %v1184_v6  ;;  %v1159_v42 = vsel %vm381_vm1, %v3464_v12, %v1138_v14  ;;  %v1025_v57 = vmul.f32 %v1843_v20, %v3466_v45  ;;  %1784 = vmatprep.mubr.f32.mxu1 %v1261_v36  ;;  %v1186_v15 = vmul.f32 %v1058_v50, %v3467_v26  ;;  %v3468_v6 = vld [vmem:[#allocation13_spill] sm:$0xff]  ;;  %v3470_v36 = vld [vmem:[#allocation12_spill] sm:$0xff] }
 0x295   :  { %v1248_v18 = vadd.f32 %v1232_v25, %v2871_v22  ;;  %v1233_v16 = vadd.f32 %v1217_v55, %v1159_v42  ;;  %v3044_v35 = vmax.f32 %v1046_v34, 0.0  ;;  %1785 = vmatmul.mubr.f32.vlgmr.msra.gmra.mxu1 %v2880_v31  ;;  %v1090_v17 = vrot.slane %v1074_v32, 7 }
 0x296   :  { %v1202_v4 = vmul.f32 %v1058_v50, %v3468_v6  ;;  %v1124_v21 = vmul.f32 %v1060_v51, %v3469_v59  ;;  %v1048_v37 = vmul.f32 %v2793_v53, %v1025_v57  ;;  %1787 = vmatprep.mubr.f32.mxu1 %v1263_v7  ;;  %v1076_v22 = vmul.f32 %v1060_v51, %v3470_v36  ;;  %v3474_v7 = vld [vmem:[#allocation56_spill] sm:$0xff]  ;;  %v3478_v59 = vld [vmem:[#allocation18_spill] sm:$0xff] }
 0x297   :  { %v1264_v47 = vadd.f32 %v1248_v18, %v2883_v38  ;;  %v1249_v11 = vadd.f32 %v1233_v16, %v1168_v8  ;;  %v1845_v25 = vpop.eup %1844  ;;  %v3471_v55 = vrot.slane %v2874_v40, 7  ;;  %v3472_v31 = vrot.slane %v2889_v60, 1  ;;  %v3475_v8 = vld [vmem:[#allocation23_spill] sm:$0xff] }
 0x298   :  { %v3473_v32 = vrot.slane %v2892_v27, 7  ;;  %v1140_v38 = vrot.slane %v1124_v21, 1  ;;  %v1027_v12 = vmul.f32 %v1845_v25, %v3474_v7  ;;  %v1170_v40 = vmul.f32 %v1058_v50, %v3475_v8  ;;  %v3477_v18 = vld [vmem:[#allocation27_spill] sm:$0xff] }
 0x299   :  { %v1111_v34 = vsel %vm252_vm0, %v3471_v55, %v1090_v17  ;;  %v1158_v39 = vsel %vm381_vm1, %v1138_v14, %v3472_v31  ;;  %v1265_v42 = vadd.f32 %v1249_v11, %v1186_v15  ;;  %1788 = vmatmul.mubr.f32.gmra.mxu1 %v1264_v47  ;;  %v3476_v45 = vmov %v3472_v31  ;;  %v3483_v31 = vld [vmem:[#allocation30_spill] sm:$0xff] }
 0x29a   :  { %v1110_v20 = vsel %vm252_vm0, %v1090_v17, %v3473_v32  ;;  %v1218_v2 = vadd.f32 %v1202_v4, %v1111_v34  ;;  %v1157_v57 = vsel %vm381_vm1, %v3476_v45, %v1140_v38  ;;  %v1188_v14 = vmul.f32 %v1060_v51, %v3477_v18  ;;  %v3479_v4 = vld [vmem:[#allocation19_spill] sm:$0xff] }
 0x29b   :  { %v1219_v26 = vadd.f32 %v2904_v28, %v1110_v20  ;;  %v1092_v16 = vrot.slane %v1076_v22, 7  ;;  %v3072_v6 = vmax.f32 %v1048_v37, 0.0  ;;  %1790 = vmatprep.mubr.f32.mxu1 %v1265_v42  ;;  %v1204_v15 = vmul.f32 %v1060_v51, %v3478_v59  ;;  %v3484_v20 = vld [vmem:[#allocation17_spill] sm:$0xff] }
 0x29c   :  { %v1234_v17 = vadd.f32 %v1218_v2, %v1158_v39  ;;  %v1126_v50 = vmul.f32 %v3044_v35, %v3479_v4  ;;  %v3480_v60 = vmov %v3473_v32  ;;  %v3481_v11 = vrot.slane %v2907_v58, 1  ;;  %v3489_v58 = vld [vmem:[#allocation24_spill] sm:$0xff] }
 0x29d   :  { %v1235_v21 = vadd.f32 %v1219_v26, %v1157_v57  ;;  %v1109_v47 = vsel %vm252_vm0, %v3480_v60, %v1092_v16  ;;  %v3482_v37 = vrot.slane %v2913_v33, 7  ;;  %v1050_v22 = vmul.f32 %v2793_v53, %v1027_v12  ;;  %v3486_v12 = vld [vmem:[#allocation35_spill] sm:$0xff] }
 0x29e   :  { %v1156_v28 = vsel %vm381_vm1, %v1140_v38, %v3481_v11  ;;  %v1250_v25 = vadd.f32 %v1234_v17, %v2898_v9  ;;  %v1220_v55 = vadd.f32 %v1204_v15, %v1109_v47  ;;  %v1142_v34 = vrot.slane %v1126_v50, 1 }
 0x29f   :  { %v1108_v36 = vsel %vm252_vm0, %v1092_v16, %v3482_v37  ;;  %v1251_v27 = vadd.f32 %v1235_v21, %v1170_v40  ;;  %v1172_v39 = vmul.f32 %v1060_v51, %v3483_v31  ;;  %v1078_v7 = vmul.f32 %v3044_v35, %v3484_v20  ;;  %v3487_v51 = vld [vmem:[#allocation26_spill] sm:$0xff] }
 0x2a0   :  { %v1221_v32 = vadd.f32 %v2924_v13, %v1108_v36  ;;  %v1266_v38 = vadd.f32 %v1250_v25, %v2901_v44  ;;  %v1236_v42 = vadd.f32 %v1220_v55, %v1156_v28  ;;  %v3485_v2 = vmov %v3481_v11  ;;  %v3488_v44 = vld [vmem:[#allocation25_spill] sm:$0xff]  ;;  %v3495_v55 = vld [vmem:[#allocation38_spill] sm:$0xff] }
 0x2a1   :  { %v1155_v53 = vsel %vm381_vm1, %v3485_v2, %v1142_v34  ;;  %v1190_v9 = vmul.f32 %v3044_v35, %v3486_v12  ;;  %v1267_v8 = vadd.f32 %v1251_v27, %v1188_v14  ;;  %v1094_v45 = vrot.slane %v1078_v7, 7  ;;  %v3501_v12 = vld [vmem:[#allocation32_spill] sm:$0xff] }
 0x2a2   :  { %v1237_v40 = vadd.f32 %v1221_v32, %v1155_v53  ;;  %v1128_v13 = vmul.f32 %v3072_v6, %v3487_v51  ;;  %v1066_v57 = vmax.f32 %v1050_v22, 0.0  ;;  %1791 = vmatmul.mubr.f32.gmra.mxu1 %v1266_v38  ;;  %v1252_v18 = vadd.f32 %v1236_v42, %v2910_v23  ;;  %v3494_v22 = vld [vmem:[#allocation33_spill] sm:$0xff]  ;;  %v3499_v38 = vld [vmem:[#allocation34_spill] sm:$0xff]  ;;  %v3502_v51 = vld [vmem:[#allocation43_spill] sm:$0xff] }
 0x2a3   :  { %v1206_v26 = vmul.f32 %v3044_v35, %v3488_v44  ;;  %v1080_v16 = vmul.f32 %v3072_v6, %v3489_v58  ;;  %1793 = vmatprep.mubr.f32.mxu1 %v1267_v8  ;;  %v3490_v59 = vmov %v3482_v37  ;;  %v3491_v15 = vrot.slane %v2937_v29, 7 }
 0x2a4   :  { %v1253_v17 = vadd.f32 %v1237_v40, %v1172_v39  ;;  %v1107_v14 = vsel %vm252_vm0, %v3490_v59, %v1094_v45  ;;  %v1144_v50 = vrot.slane %v1128_v13, 1  ;;  %v1268_v23 = vadd.f32 %v1252_v18, %v2921_v43  ;;  %v3504_v59 = vld [vmem:[#allocation44_spill] sm:$0xff] }
 0x2a5   :  { %v1106_v4 = vsel %vm252_vm0, %v1094_v45, %v3491_v15  ;;  %v1222_v21 = vadd.f32 %v1206_v26, %v1107_v14  ;;  %v1096_v47 = vrot.slane %v1080_v16, 7  ;;  %v3492_v28 = vrot.slane %v2934_v48, 1 }
 0x2a6   :  { %v1223_v60 = vadd.f32 %v2947_v62, %v1106_v4  ;;  %v1269_v11 = vadd.f32 %v1253_v17, %v1190_v9  ;;  %v1208_v25 = vmul.f32 %v3072_v6, %v3494_v22  ;;  %1794 = vmatmul.mubr.f32.gmra.mxu1 %v1268_v23  ;;  %v1174_v62 = vmul.f32 %v3044_v35, %v3495_v55  ;;  %v3506_v4 = vld [vmem:[#allocation48_spill] sm:$0xff] }
 0x2a7   :  { %v1154_v33 = vsel %vm381_vm1, %v1142_v34, %v3492_v28  ;;  %v3493_v37 = vmov %v3492_v28  ;;  %v3496_v31 = vmov %v3491_v15  ;;  %v3497_v34 = vld [vmem:[#allocation41_spill] sm:$0xff]  ;;  %v3498_v20 = vrot.slane %v2959_v3, 7 }
 0x2a8   :  { %v1153_v36 = vsel %vm381_vm1, %v3493_v37, %v1144_v50  ;;  %v1238_v43 = vadd.f32 %v1222_v21, %v1154_v33  ;;  %v1105_v39 = vsel %vm252_vm0, %v3496_v31, %v1096_v47  ;;  %1796 = vmatprep.mubr.f32.mxu1 %v1269_v11  ;;  %v1192_v48 = vmul.f32 %v3072_v6, %v3497_v34  ;;  %v3510_v33 = vld [vmem:[#allocation45_spill] sm:$0xff]  ;;  %v3513_v31 = vld [vmem:[#allocation47_spill] sm:$0xff] }
 0x2a9   :  { %v1239_v27 = vadd.f32 %v1223_v60, %v1153_v36  ;;  %v1224_v32 = vadd.f32 %v1208_v25, %v1105_v39  ;;  %v1104_v7 = vsel %vm252_vm0, %v1096_v47, %v3498_v20  ;;  %v1130_v42 = vmul.f32 %v1066_v57, %v3499_v38  ;;  %v3512_v25 = vld [vmem:[#allocation50_spill] sm:$0xff] }
 0x2aa   :  { %v1254_v35 = vadd.f32 %v1238_v43, %v2927_v19  ;;  %v3500_v29 = vrot.slane %v2951_v61, 1  ;;  %v1082_v9 = vmul.f32 %v1066_v57, %v3501_v12  ;;  %v1099_v45 = vrot.slane %v3005_v52, 7  ;;  %v3505_v52 = vld [vmem:[#allocation42_spill] sm:$0xff]  ;;  %v3520_v12 = vld [vmem:[#allocation57_spill] sm:$0xff] }
 0x2ab   :  { %v1255_v2 = vadd.f32 %v1239_v27, %v1174_v62  ;;  %v1146_v40 = vrot.slane %v1130_v42, 1  ;;  %v1211_v13 = vmul.f32 %v2961_v63, %v3502_v51  ;;  %v1225_v19 = vadd.f32 %v2978_v46, %v1104_v7  ;;  %v3518_v7 = vld [vmem:[#allocation49_spill] sm:$0xff] }
 0x2ac   :  { %v1152_v53 = vsel %vm381_vm1, %v1144_v50, %v3500_v29  ;;  %v1270_v18 = vadd.f32 %v1254_v35, %v2944_v24  ;;  %v1098_v26 = vrot.slane %v1082_v9, 7  ;;  %v3503_v16 = vmov %v3500_v29 }
 0x2ad   :  { %v1240_v8 = vadd.f32 %v1224_v32, %v1152_v53  ;;  %v1271_v44 = vadd.f32 %v1255_v2, %v1192_v48  ;;  %v1151_v17 = vsel %vm381_vm1, %v3503_v16, %v1146_v40  ;;  %v1176_v14 = vmul.f32 %v3072_v6, %v3504_v59  ;;  %v3514_v48 = vld [vmem:[#allocation59_spill] sm:$0xff] }
 0x2ae   :  { %v1210_v15 = vmul.f32 %v1066_v57, %v3505_v52  ;;  %1797 = vmatmul.mubr.f32.gmra.mxu1 %v1270_v18  ;;  %v1194_v50 = vmul.f32 %v1066_v57, %v3506_v4  ;;  %v1241_v24 = vadd.f32 %v1225_v19, %v1151_v17  ;;  %v3507_v23 = vmov %v3498_v20  ;;  %v3519_v53 = vld [vmem:[#allocation51_spill] sm:$0xff] }
 0x2af   :  { %v1256_v58 = vadd.f32 %v1240_v8, %v2954_v0  ;;  %v1103_v46 = vsel %vm252_vm0, %v3507_v23, %v1098_v26  ;;  %v1102_v61 = vsel %vm252_vm0, %v1098_v26, %v1099_v45  ;;  %1799 = vmatprep.mubr.f32.mxu1 %v1271_v44  ;;  %v3508_v6 = vrot.slane %v2965_v54, 7  ;;  %v3511_v54 = vld [vmem:[#allocation46_spill] sm:$0xff] }
 0x2b0   :  { %v1226_v21 = vadd.f32 %v1210_v15, %v1103_v46  ;;  %v1227_v60 = vadd.f32 %v1211_v13, %v1102_v61  ;;  %v1257_v11 = vadd.f32 %v1241_v24, %v1176_v14  ;;  %v1150_v3 = vsel %vm381_vm1, %v1146_v40, %v1147_v56 }
 0x2b1   :  { %v1272_v0 = vadd.f32 %v1256_v58, %v2972_v5  ;;  %v1101_v47 = vsel %vm252_vm0, %v1099_v45, %v3508_v6  ;;  %v3509_v28 = vrot.slane %v2982_v1, 1  ;;  %v1212_v37 = vmul.f32 %v2941_v41, %v3510_v33 }
 0x2b2   :  { %v1177_v36 = vmul.f32 %v2918_v30, %v3511_v54  ;;  %v1242_v22 = vadd.f32 %v1226_v21, %v1150_v3  ;;  %v1178_v43 = vmul.f32 %v1066_v57, %v3512_v25  ;;  %v1273_v62 = vadd.f32 %v1257_v11, %v1194_v50  ;;  %v3517_v30 = vld [vmem:[#allocation52_spill] sm:$0xff] }
 0x2b3   :  { %v1149_v5 = vsel %vm381_vm1, %v1147_v56, %v3509_v28  ;;  %1800 = vmatmul.mubr.f32.gmra.mxu1 %v1272_v0  ;;  %v1228_v27 = vadd.f32 %v1212_v37, %v1101_v47  ;;  %v1195_v39 = vmul.f32 %v2961_v63, %v3513_v31  ;;  %v3515_v56 = vrot.slane %v3514_v48, 1 }
 0x2b4   :  { %v1243_v55 = vadd.f32 %v1227_v60, %v1149_v5  ;;  %v1258_v10 = vadd.f32 %v1242_v22, %v1177_v36  ;;  %v3516_v32 = vmov %v3509_v28  ;;  %1802 = vmatprep.mubr.f32.mxu1 %v1273_v62  ;;  %v1196_v57 = vmul.f32 %v2941_v41, %v3517_v30 }
 0x2b5   :  { %v1164_v20 = vsel %vm381_vm1, %v3516_v32, %v3515_v56  ;;  %v1179_v38 = vmul.f32 %v2961_v63, %v3518_v7  ;;  %v1181_v9 = vmul.f32 %v3520_v12, %v3519_v53 }
 0x2b6   :  { %v1259_v34 = vadd.f32 %v1243_v55, %v1178_v43  ;;  %v1244_v42 = vadd.f32 %v1228_v27, %v1164_v20  ;;  %v1274_v35 = vadd.f32 %v1258_v10, %v1195_v39 }
 0x2b8   :  { %v1275_v2 = vadd.f32 %v1259_v34, %v1196_v57  ;;  %v1260_v29 = vadd.f32 %v1244_v42, %v1179_v38  ;;  %1803 = vmatmul.mubr.f32.gmra.mxu1 %v1274_v35 }
 0x2ba   :  { %1805 = vmatprep.mubr.f32.mxu1 %v1275_v2  ;;  %v1276_v1 = vadd.f32 %v1260_v29, %v1181_v9 }
 0x2bc   :  { %1806 = vmatmul.mubr.f32.gmra.mxu1 %v1276_v1 }
 0x355   :  { %v1786_v8 = vpop.f32.mrf.mxu1 }
 0x356   :  { %v3205_v41 = vadd.f32 %v1786_v8, %v1630_v49 }
 0x357   :  { %v1366_v40 = vpop.f32.mrf.mxu1 }
 0x358   :  { %v1446_v63 = vmul.f32 %v3205_v41, %v3205_v41  ;;  %v3209_v45 = vadd.f32 %v1630_v49, %v1366_v40 }
 0x359   :  { %v1789_v51 = vpop.f32.mrf.mxu1 }
 0x35a   :  { %v3211_v13 = vadd.f32 %v1789_v51, %v1630_v49  ;;  %1463 = vadd.xlane.f32.xlu0 %v1446_v63  ;;  %v1445_v18 = vmul.f32 %v3209_v45, %v3209_v45 }
 0x35b   :  { %v1376_v44 = vpop.f32.mrf.mxu1 }
 0x35c   :  { %v1448_v19 = vmul.f32 %v3211_v13, %v3211_v13  ;;  %v3217_v26 = vadd.f32 %v1630_v49, %v1376_v44  ;;  %1461 = vadd.xlane.f32.xlu1 %v1445_v18 }
 0x35e   :  { %1467 = vadd.xlane.f32.xlu0 %v1448_v19  ;;  %v1447_v58 = vmul.f32 %v3217_v26, %v3217_v26  ;;  %v3272_v19 = vld [vmem:[%s3320_s11] ss:$0 sm:$0xff]  ;;  %s1901_s11 = smov [#allocation2]  }
 0x35f   :  { %s1617_s18 = sshll.u32 %s1901_s11, 4  ;;  %s1618_s18 = int_to_ptr.vmem [resolvable:$true] %s1617_s18 }
 0x360   :  { %1465 = vadd.xlane.f32.xlu1 %v1447_v58  ;;  %s1878_s19 = scalar_lea.vmem %s1618_s18, 2048  ;;  %p1883_p1 = scmp.lt.s32.totalorder %s1618_s18, %s1618_s18 }
 0x361   :  { %p1879_p0 = scmp.ne.s32.totalorder %s1618_s18, %s1878_s19  ;;  %p1884_p2 = scmp.lt.s32.totalorder %s1878_s19, %s1878_s19 }
 0x362   :  { %v1792_v16 = vpop.f32.mrf.mxu1 }
 0x363   :  { %v3221_v17 = vadd.f32 %v1792_v16, %v1630_v49  ;;  %p1885_p3 = por %p1884_p2, %p1883_p1 }
 0x364   :  { %v1386_v59 = vpop.f32.mrf.mxu1 }
 0x365   :  { %v1450_v14 = vmul.f32 %v3221_v17, %v3221_v17  ;;  %v3225_v52 = vadd.f32 %v1630_v49, %v1386_v59  ;;  %p1886_p4 = pnand %p1885_p3, %p1879_p0 }
 0x366   :  { %v1795_v15 = vpop.f32.mrf.mxu1 }
 0x367   :  { %v1449_v4 = vmul.f32 %v3225_v52, %v3225_v52  ;;  %v3229_v50 = vadd.f32 %v1795_v15, %v1630_v49  ;;  %1471 = vadd.xlane.f32.xlu0 %v1450_v14 }
 0x368   :  { %v1396_v24 = vpop.f32.mrf.mxu1 }
 0x369   :  { %v1452_v23 = vmul.f32 %v3229_v50, %v3229_v50  ;;  %v3233_v46 = vadd.f32 %v1630_v49, %v1396_v24  ;;  %1469 = vadd.xlane.f32.xlu1 %v1449_v4 }
 0x36b   :  { %v1451_v61 = vmul.f32 %v3233_v46, %v3233_v46  ;;  %1475 = vadd.xlane.f32.xlu0 %v1452_v23 }
 0x36d   :  { %1473 = vadd.xlane.f32.xlu1 %v1451_v61 }
 0x36e   :  { %v1798_v0 = vpop.f32.mrf.mxu1 }
 0x36f   :  { %v3237_v21 = vadd.f32 %v1798_v0, %v1630_v49 }
 0x370   :  { %v1406_v60 = vpop.f32.mrf.mxu1 }
 0x371   :  { %v1454_v6 = vmul.f32 %v3237_v21, %v3237_v21  ;;  %v3241_v47 = vadd.f32 %v1630_v49, %v1406_v60 }
 0x373   :  { %v1801_v11 = vpop.f32.mrf.mxu1  ;;  %v1453_v3 = vmul.f32 %v3241_v47, %v3241_v47  ;;  %1479 = vadd.xlane.f32.xlu0 %v1454_v6 }
 0x374   :  { %v3245_v28 = vadd.f32 %v1801_v11, %v1630_v49 }
 0x375   :  { %v1416_v5 = vpop.f32.mrf.mxu1  ;;  %1477 = vadd.xlane.f32.xlu1 %v1453_v3 }
 0x376   :  { %v1456_v33 = vmul.f32 %v3245_v28, %v3245_v28  ;;  %v3249_v37 = vadd.f32 %v1630_v49, %v1416_v5 }
 0x378   :  { %v1455_v54 = vmul.f32 %v3249_v37, %v3249_v37  ;;  %v1804_v36 = vpop.f32.mrf.mxu1  ;;  %1483 = vadd.xlane.f32.xlu0 %v1456_v33 }
 0x379   :  { %v3253_v22 = vadd.f32 %v1804_v36, %v1630_v49 }
 0x37a   :  { %v1426_v25 = vpop.f32.mrf.mxu1  ;;  %1481 = vadd.xlane.f32.xlu1 %v1455_v54 }
 0x37b   :  { %v1458_v43 = vmul.f32 %v3253_v22, %v3253_v22  ;;  %v3257_v55 = vadd.f32 %v1630_v49, %v1426_v25 }
 0x37c   :  { %v1807_v62 = vpop.f32.mrf.mxu1 }
 0x37d   :  { %v1457_v27 = vmul.f32 %v3257_v55, %v3257_v55  ;;  %v3261_v31 = vadd.f32 %v1807_v62, %v1630_v49  ;;  %1487 = vadd.xlane.f32.xlu0 %v1458_v43 }
 0x37e   :  { %v1436_v39 = vpop.f32.mrf.mxu1 }
 0x37f   :  { %v1460_v10 = vmul.f32 %v3261_v31, %v3261_v31  ;;  %v3265_v34 = vadd.f32 %v1630_v49, %v1436_v39  ;;  %1485 = vadd.xlane.f32.xlu1 %v1457_v27 }
 0x381   :  { %v1459_v48 = vmul.f32 %v3265_v34, %v3265_v34  ;;  %1491 = vadd.xlane.f32.xlu0 %v1460_v10 }
 0x383   :  { %1489 = vadd.xlane.f32.xlu1 %v1459_v48 }
 0x3e3   :  { %v1464_v56 = vpop.xlane.xlu0 %1463 }
 0x3e4   :  { %v1494_v32 = vmul.f32 0.015625, %v1464_v56 }
 0x3e5   :  { %v1462_v20 = vpop.xlane.xlu1 %1461 }
 0x3e6   :  { %v1510_v30 = vadd.f32 1e-12, %v1494_v32  ;;  %v1493_v57 = vmul.f32 0.015625, %v1462_v20 }
 0x3e7   :  { %v1468_v7 = vpop.xlane.xlu0 %1467 }
 0x3e8   :  { %1846 = vrsqrt.f32 %v1510_v30  ;;  %v1509_v38 = vadd.f32 1e-12, %v1493_v57  ;;  %v1496_v42 = vmul.f32 0.015625, %v1468_v7 }
 0x3e9   :  { %v1466_v35 = vpop.xlane.xlu1 %1465 }
 0x3ea   :  { %1848 = vrsqrt.f32 %v1509_v38  ;;  %v1512_v2 = vadd.f32 1e-12, %v1496_v42  ;;  %v1495_v29 = vmul.f32 0.015625, %v1466_v35 }
 0x3ec   :  { %1850 = vrsqrt.f32 %v1512_v2  ;;  %v1511_v53 = vadd.f32 1e-12, %v1495_v29 }
 0x3ee   :  { %1852 = vrsqrt.f32 %v1511_v53 }
 0x3f0   :  { %v1472_v12 = vpop.xlane.xlu0 %1471 }
 0x3f1   :  { %v1498_v9 = vmul.f32 0.015625, %v1472_v12 }
 0x3f2   :  { %v1470_v1 = vpop.xlane.xlu1 %1469 }
 0x3f3   :  { %v1514_v49 = vadd.f32 1e-12, %v1498_v9  ;;  %v1497_v8 = vmul.f32 0.015625, %v1470_v1 }
 0x3f4   :  { %v1476_v40 = vpop.xlane.xlu0 %1475 }
 0x3f5   :  { %1854 = vrsqrt.f32 %v1514_v49  ;;  %v1513_v63 = vadd.f32 1e-12, %v1497_v8  ;;  %v1500_v51 = vmul.f32 0.015625, %v1476_v40  ;;  %v1847_v44 = vpop.eup %1846 }
 0x3f6   :  { %v1474_v18 = vpop.xlane.xlu1 %1473  ;;  %v1542_v59 = vmul.f32 %v1847_v44, %v3205_v41 }
 0x3f7   :  { %1856 = vrsqrt.f32 %v1513_v63  ;;  %v1516_v58 = vadd.f32 1e-12, %v1500_v51  ;;  %v1499_v16 = vmul.f32 0.015625, %v1474_v18  ;;  %v1849_v14 = vpop.eup %1848 }
 0x3f8   :  { %v1565_v4 = vmul.f32 %v3272_v19, %v1542_v59  ;;  %v1541_v24 = vmul.f32 %v1849_v14, %v3209_v45 }
 0x3f9   :  { %1858 = vrsqrt.f32 %v1516_v58  ;;  %v1515_v15 = vadd.f32 1e-12, %v1499_v16  ;;  %v1851_v61 = vpop.eup %1850 }
 0x3fa   :  { %v1581_v60 = vmax.f32 %v1565_v4, 0.0  ;;  %v1564_v6 = vmul.f32 %v3272_v19, %v1541_v24  ;;  %v1544_v11 = vmul.f32 %v1851_v61, %v3211_v13 }
 0x3fb   :  { %1860 = vrsqrt.f32 %v1515_v15  ;;  %v1853_v5 = vpop.eup %1852 }
 0x3fc   :  { %v1480_v23 = vpop.xlane.xlu0 %1479  ;;  %1597 = vst [vmem:[#allocation2 + $0x8] sm:$0xff] %v1581_v60  ;;  %v1580_v54 = vmax.f32 %v1564_v6, 0.0  ;;  %v1567_v36 = vmul.f32 %v3272_v19, %v1544_v11  ;;  %v1543_v25 = vmul.f32 %v1853_v5, %v3217_v26 }
 0x3fd   :  { %v1502_v0 = vmul.f32 0.015625, %v1480_v23 }
 0x3fe   :  { %v1478_v3 = vpop.xlane.xlu1 %1477  ;;  %1596 = vst [vmem:[#allocation2] sm:$0xff] %v1580_v54  ;;  %v1583_v27 = vmax.f32 %v1567_v36, 0.0  ;;  %v1566_v39 = vmul.f32 %v3272_v19, %v1543_v25 }
 0x3ff   :  { %v1518_v33 = vadd.f32 1e-12, %v1502_v0  ;;  %v1501_v41 = vmul.f32 0.015625, %v1478_v3 }
 0x400   :  { %1599 = vst [vmem:[#allocation2 + $0x18] sm:$0xff] %v1583_v27  ;;  %v1582_v32 = vmax.f32 %v1566_v39, 0.0 }
 0x401   :  { %v1484_v45 = vpop.xlane.xlu0 %1483  ;;  %1862 = vrsqrt.f32 %v1518_v33  ;;  %v1517_v43 = vadd.f32 1e-12, %v1501_v41 }
 0x402   :  { %v1504_v62 = vmul.f32 0.015625, %v1484_v45  ;;  %v1855_v56 = vpop.eup %1854  ;;  %1598 = vst [vmem:[#allocation2 + $0x10] sm:$0xff] %v1582_v32 }
 0x403   :  { %v1482_v10 = vpop.xlane.xlu1 %1481  ;;  %1864 = vrsqrt.f32 %v1517_v43  ;;  %v1546_v20 = vmul.f32 %v1855_v56, %v3221_v17 }
 0x404   :  { %v1520_v13 = vadd.f32 1e-12, %v1504_v62  ;;  %v1503_v48 = vmul.f32 0.015625, %v1482_v10  ;;  %v1857_v57 = vpop.eup %1856 }
 0x405   :  { %v1569_v38 = vmul.f32 %v3272_v19, %v1546_v20  ;;  %v1545_v42 = vmul.f32 %v1857_v57, %v3225_v52 }
 0x406   :  { %1866 = vrsqrt.f32 %v1520_v13  ;;  %v1519_v30 = vadd.f32 1e-12, %v1503_v48  ;;  %v1488_v26 = vpop.xlane.xlu0 %1487  ;;  %v1859_v2 = vpop.eup %1858 }
 0x407   :  { %v1506_v7 = vmul.f32 0.015625, %v1488_v26  ;;  %v1585_v12 = vmax.f32 %v1569_v38, 0.0  ;;  %v1568_v9 = vmul.f32 %v3272_v19, %v1545_v42  ;;  %v1548_v17 = vmul.f32 %v1859_v2, %v3229_v50 }
 0x408   :  { %1868 = vrsqrt.f32 %v1519_v30  ;;  %v1486_v35 = vpop.xlane.xlu1 %1485  ;;  %v1861_v49 = vpop.eup %1860 }
 0x409   :  { %v1522_v29 = vadd.f32 1e-12, %v1506_v7  ;;  %v1505_v53 = vmul.f32 0.015625, %v1486_v35  ;;  %1601 = vst [vmem:[#allocation2 + $0x28] sm:$0xff] %v1585_v12  ;;  %v1584_v63 = vmax.f32 %v1568_v9, 0.0  ;;  %v1571_v51 = vmul.f32 %v3272_v19, %v1548_v17 }
 0x40a   :  { %v1492_v1 = vpop.xlane.xlu0 %1491  ;;  %v1547_v52 = vmul.f32 %v1861_v49, %v3233_v46 }
 0x40b   :  { %1870 = vrsqrt.f32 %v1522_v29  ;;  %v1521_v8 = vadd.f32 1e-12, %v1505_v53  ;;  %v1508_v40 = vmul.f32 0.015625, %v1492_v1  ;;  %1600 = vst [vmem:[#allocation2 + $0x20] sm:$0xff] %v1584_v63  ;;  %v1587_v16 = vmax.f32 %v1571_v51, 0.0 }
 0x40c   :  { %v1490_v18 = vpop.xlane.xlu1 %1489  ;;  %v1570_v59 = vmul.f32 %v3272_v19, %v1547_v52 }
 0x40d   :  { %1872 = vrsqrt.f32 %v1521_v8  ;;  %v1524_v44 = vadd.f32 1e-12, %v1508_v40  ;;  %v1507_v58 = vmul.f32 0.015625, %v1490_v18  ;;  %1603 = vst [vmem:[#allocation2 + $0x38] sm:$0xff] %v1587_v16 }
 0x40e   :  { %v1863_v50 = vpop.eup %1862  ;;  %v1586_v15 = vmax.f32 %v1570_v59, 0.0 }
 0x40f   :  { %1874 = vrsqrt.f32 %v1524_v44  ;;  %v1523_v14 = vadd.f32 1e-12, %v1507_v58  ;;  %v1550_v4 = vmul.f32 %v1863_v50, %v3237_v21 }
 0x410   :  { %v1865_v24 = vpop.eup %1864  ;;  %1602 = vst [vmem:[#allocation2 + $0x30] sm:$0xff] %v1586_v15 }
 0x411   :  { %1876 = vrsqrt.f32 %v1523_v14  ;;  %v1573_v46 = vmul.f32 %v3272_v19, %v1550_v4  ;;  %v1549_v23 = vmul.f32 %v1865_v24, %v3241_v47 }
 0x413   :  { %v1867_v61 = vpop.eup %1866  ;;  %v1589_v0 = vmax.f32 %v1573_v46, 0.0  ;;  %v1572_v60 = vmul.f32 %v3272_v19, %v1549_v23 }
 0x414   :  { %v1552_v6 = vmul.f32 %v1867_v61, %v3245_v28 }
 0x415   :  { %v1869_v11 = vpop.eup %1868  ;;  %1605 = vst [vmem:[#allocation2 + $0x48] sm:$0xff] %v1589_v0  ;;  %v1588_v3 = vmax.f32 %v1572_v60, 0.0 }
 0x416   :  { %v1575_v5 = vmul.f32 %v3272_v19, %v1552_v6  ;;  %v1551_v21 = vmul.f32 %v1869_v11, %v3249_v37 }
 0x417   :  { %1604 = vst [vmem:[#allocation2 + $0x40] sm:$0xff] %v1588_v3 }
 0x418   :  { %v1871_v33 = vpop.eup %1870  ;;  %v1591_v41 = vmax.f32 %v1575_v5, 0.0  ;;  %v1574_v54 = vmul.f32 %v3272_v19, %v1551_v21 }
 0x419   :  { %v1554_v47 = vmul.f32 %v1871_v33, %v3253_v22 }
 0x41a   :  { %v1873_v36 = vpop.eup %1872  ;;  %1607 = vst [vmem:[#allocation2 + $0x58] sm:$0xff] %v1591_v41  ;;  %v1590_v25 = vmax.f32 %v1574_v54, 0.0 }
 0x41b   :  { %v1577_v45 = vmul.f32 %v3272_v19, %v1554_v47  ;;  %v1553_v28 = vmul.f32 %v1873_v36, %v3257_v55 }
 0x41c   :  { %v1875_v43 = vpop.eup %1874  ;;  %1606 = vst [vmem:[#allocation2 + $0x50] sm:$0xff] %v1590_v25 }
 0x41d   :  { %v1593_v62 = vmax.f32 %v1577_v45, 0.0  ;;  %v1576_v27 = vmul.f32 %v3272_v19, %v1553_v28  ;;  %v1556_v37 = vmul.f32 %v1875_v43, %v3261_v31 }
 0x41e   :  { %v1877_v39 = vpop.eup %1876 }
 0x41f   :  { %1609 = vst [vmem:[#allocation2 + $0x68] sm:$0xff] %v1593_v62  ;;  %v1592_v10 = vmax.f32 %v1576_v27, 0.0  ;;  %v1579_v13 = vmul.f32 %v3272_v19, %v1556_v37  ;;  %v1555_v22 = vmul.f32 %v1877_v39, %v3265_v34 }
 0x421   :  { %1608 = vst [vmem:[#allocation2 + $0x60] sm:$0xff] %v1592_v10  ;;  %v1595_v48 = vmax.f32 %v1579_v13, 0.0  ;;  %v1578_v55 = vmul.f32 %v3272_v19, %v1555_v22 }
 0x423   :  { %1611 = vst [vmem:[#allocation2 + $0x78] sm:$0xff] %v1595_v48  ;;  %v1594_v56 = vmax.f32 %v1578_v55, 0.0 }
 0x425   :  { %1610 = vst [vmem:[#allocation2 + $0x70] sm:$0xff] %v1594_v56 }
 0x426   :  { %1889 = shalt.err (!%p1886_p4)
}
 0x427   :  { %s1902_s20 = smov 128   ;;  %s1903_s21 = smov 8  }
 0x428   :  { %1623 = dma.vmem_to_hbm [thread:$0]  %s1618_s18, 2048, %s3321_s12, [#allocation3], %s1902_s20, %s1902_s20, %s1903_s21  }
 0x429   :  { %1898 = dma.done.wait [#allocation3], 2048  }
 0x42a   :  { %1899 = vsyncadd [#allocation3], 4294965248 }
 0x42b   :  { %1627 = vsyncpa [#allocation3], 1 }

</bundles_post_ra>
